<compile_context>
chip_gen: v7x
topology: tpu7x:2x2x1
jax: 0.10.0
libtpu: 0.0.40
codegen_flags: <defaults>
</compile_context>

<pallas_src>
import functools
import math

import jax
import jax.numpy as jnp
from jax import lax
from jax.experimental import pallas as pl
from jax.experimental.pallas import tpu as pltpu


# ----------------------------- in-kernel helpers ---------------------------- #

def _layernorm(x, g, b):
    # f32 statistics, eps=1e-12 (HF BERT).
    m = jnp.mean(x, axis=-1, keepdims=True)
    c = x - m
    v = jnp.mean(c * c, axis=-1, keepdims=True)
    return c * lax.rsqrt(v + 1e-12) * g + b


def _erf(x):
    # Abramowitz & Stegun 7.1.26 polynomial (|abs err| < 1.5e-7): keeps exact
    # erf-GELU semantics in-kernel without relying on an erf lowering in Mosaic.
    p = 0.3275911
    a1, a2, a3, a4, a5 = (0.254829592, -0.284496736, 1.421413741,
                          -1.453152027, 1.061405429)
    sgn = jnp.where(x >= 0.0, 1.0, -1.0)
    ax = jnp.abs(x)
    t = pl.reciprocal(1.0 + p * ax, approx=False)
    poly = ((((a5 * t + a4) * t + a3) * t + a2) * t + a1) * t
    return sgn * (1.0 - poly * jnp.exp(-ax * ax))


def _gelu(x):
    return 0.5 * x * (1.0 + _erf(x * 0.7071067811865476))


# --------------------------- fused encoder kernel --------------------------- #

def _encoder_kernel(x0_ref, mask_ref, eg_ref, eb_ref,
                    qkvw_ref, qkvb_ref, aow_ref, aob_ref, alg_ref, alb_ref,
                    iw_ref, ib_ref, ow_ref, ob_ref, olg_ref, olb_ref,
                    out_ref, act_ref, *, heads, head_dim):
    """One (layer, batch-element) grid step of a BERT encoder.

    Grid = (L, B), B innermost so per-layer weights are DMA'd once per layer.
    act_ref (B, S, H) f32 is the VMEM-resident activation across layers.
    """
    l = pl.program_id(0)
    b = pl.program_id(1)
    H = heads * head_dim

    @pl.when(l == 0)
    def _():
        # Embedding LayerNorm initializes this batch element's resident rows.
        act_ref[b] = _layernorm(x0_ref[...], eg_ref[...], eb_ref[...])

    x = act_ref[b]                                            # (S, H) f32

    # ---- fused QKV projection (1/sqrt(Dh) pre-folded into Q weight & bias) ----
    qkv = jnp.dot(x.astype(jnp.bfloat16), qkvw_ref[...],
                  preferred_element_type=jnp.float32) + qkvb_ref[...]   # (S, 3H)
    qkv_bf = qkv.astype(jnp.bfloat16)                         # cast once, slice below

    # ---- heads-batched attention: (heads, S, Dh) operands, batched MXU dots ----
    q = jnp.stack([qkv_bf[:, h * head_dim:(h + 1) * head_dim]
                   for h in range(heads)])                    # (heads, S, Dh)
    k = jnp.stack([qkv_bf[:, H + h * head_dim:H + (h + 1) * head_dim]
                   for h in range(heads)])
    v = jnp.stack([qkv_bf[:, 2 * H + h * head_dim:2 * H + (h + 1) * head_dim]
                   for h in range(heads)])

    s = jnp.einsum('hqd,hkd->hqk', q, k,
                   preferred_element_type=jnp.float32)        # (heads, S, S) f32
    s = s + mask_ref[...][None]                               # additive key mask
    s = s - jnp.max(s, axis=-1, keepdims=True)
    p = jnp.exp(s)
    p = p * pl.reciprocal(jnp.sum(p, axis=-1, keepdims=True), approx=True)
    ctx = jnp.einsum('hqk,hkd->hqd', p.astype(jnp.bfloat16), v,
                     preferred_element_type=jnp.float32)      # (heads, S, Dh)
    ctx_bf = ctx.astype(jnp.bfloat16)

    # ---- attention output projection accumulated over heads (no ctx scratch,
    #      every intermediate is full-H lane-dense) ----
    aow = aow_ref[...]                                        # (H, H) bf16
    attn = jnp.dot(ctx_bf[0], aow[0:head_dim, :],
                   preferred_element_type=jnp.float32)        # (S, H) f32
    for h in range(1, heads):
        attn = attn + jnp.dot(ctx_bf[h],
                              aow[h * head_dim:(h + 1) * head_dim, :],
                              preferred_element_type=jnp.float32)
    x = _layernorm(attn + aob_ref[...] + x, alg_ref[...], alb_ref[...])

    # ---- FFN: intermediate + exact-erf GELU + output, residual + LayerNorm ----
    inter = _gelu(jnp.dot(x.astype(jnp.bfloat16), iw_ref[...],
                          preferred_element_type=jnp.float32) + ib_ref[...])
    ffn = jnp.dot(inter.astype(jnp.bfloat16), ow_ref[...],
                  preferred_element_type=jnp.float32) + ob_ref[...]
    x = _layernorm(ffn + x, olg_ref[...], olb_ref[...])

    act_ref[b] = x                                            # stays in VMEM
    out_ref[...] = x                                          # last layer's write wins


def encoder_forward(x_emb, add_mask, fp, heads):
    """x_emb: (B, S, H) f32 pre-LN embedding sum; add_mask: (B, 1, S) additive f32."""
    B, S, H = x_emb.shape
    L, _, H3 = fp["qkv_w"].shape
    I = fp["i_w"].shape[-1]
    head_dim = H // heads

    rep2 = lambda l, b: (0, 0)
    per_layer = lambda l, b: (l, 0, 0)
    per_batch = lambda l, b: (b, 0, 0)

    kern = functools.partial(_encoder_kernel, heads=heads, head_dim=head_dim)

    grid_spec = pltpu.PrefetchScalarGridSpec(
        num_scalar_prefetch=0,
        grid=(L, B),                                 # B innermost: weights DMA'd once/layer
        in_specs=[
            pl.BlockSpec((None, S, H), per_batch),   # embedding sum (pre-LN)
            pl.BlockSpec((None, 1, S), per_batch),   # additive attention mask
            pl.BlockSpec((1, H), rep2),              # emb LN gamma
            pl.BlockSpec((1, H), rep2),              # emb LN beta
            pl.BlockSpec((None, H, H3), per_layer),  # fused QKV weight (bf16)
            pl.BlockSpec((None, 1, H3), per_layer),  # fused QKV bias
            pl.BlockSpec((None, H, H), per_layer),   # attn output weight (bf16)
            pl.BlockSpec((None, 1, H), per_layer),   # attn output bias
            pl.BlockSpec((None, 1, H), per_layer),   # attn LN gamma
            pl.BlockSpec((None, 1, H), per_layer),   # attn LN beta
            pl.BlockSpec((None, H, I), per_layer),   # intermediate weight (bf16)
            pl.BlockSpec((None, 1, I), per_layer),   # intermediate bias
            pl.BlockSpec((None, I, H), per_layer),   # FFN output weight (bf16)
            pl.BlockSpec((None, 1, H), per_layer),   # FFN output bias
            pl.BlockSpec((None, 1, H), per_layer),   # output LN gamma
            pl.BlockSpec((None, 1, H), per_layer),   # output LN beta
        ],
        out_specs=pl.BlockSpec((None, S, H), per_batch),
        scratch_shapes=[pltpu.VMEM((B, S, H), jnp.float32)],   # resident activation
    )

    # Explicit VMEM budget (review: v7x has 64 MiB physical, 32 MiB scoped default).
    w_bytes = 2 * (H * H3 + H * H + H * I + I * H)            # bf16 matrices / layer
    b_bytes = 4 * (H3 + 5 * H + I)                            # f32 biases + LN / layer
    io_bytes = 4 * (B * S * H + 4 * S * H + S * H3 + S * I + S)
    est = 3 * (w_bytes + b_bytes) + 2 * io_bytes + (8 << 20)  # 2x buffering + headroom
    vmem_limit = int(min(64 << 20, max(est, 16 << 20)))

    return pl.pallas_call(
        kern,
        grid_spec=grid_spec,
        out_shape=jax.ShapeDtypeStruct((B, S, H), jnp.float32),
        compiler_params=pltpu.CompilerParams(
            dimension_semantics=("arbitrary", "parallel"),
            vmem_limit_bytes=vmem_limit),
    )(x_emb, add_mask, fp["emb_ln_g"], fp["emb_ln_b"],
      fp["qkv_w"], fp["qkv_b"], fp["ao_w"], fp["ao_b"],
      fp["a_ln_g"], fp["a_ln_b"], fp["i_w"], fp["i_b"],
      fp["o_w"], fp["o_b"], fp["o_ln_g"], fp["o_ln_b"])


# ------------------------------ parameters ---------------------------------- #

def _dense_params(key, fan_in, fan_out):
    w = 0.02 * jax.random.normal(key, (fan_in, fan_out), jnp.float32)
    b = jnp.zeros((fan_out,), jnp.float32)
    return w, b


def init_bert_params(key, *, vocab, hidden, layers, intermediate, max_pos,
                     type_vocab, num_out):
    keys = jax.random.split(key, 4 + layers)
    p = {
        "word_emb": 0.02 * jax.random.normal(keys[0], (vocab, hidden), jnp.float32),
        "pos_emb": 0.02 * jax.random.normal(keys[1], (max_pos, hidden), jnp.float32),
        "type_emb": 0.02 * jax.random.normal(keys[2], (type_vocab, hidden), jnp.float32),
        "emb_ln_g": jnp.ones((hidden,), jnp.float32),
        "emb_ln_b": jnp.zeros((hidden,), jnp.float32),
        "layers": [],
    }
    for l in range(layers):
        lk = jax.random.split(keys[4 + l], 6)
        lp = {}
        lp["q_w"], lp["q_b"] = _dense_params(lk[0], hidden, hidden)
        lp["k_w"], lp["k_b"] = _dense_params(lk[1], hidden, hidden)
        lp["v_w"], lp["v_b"] = _dense_params(lk[2], hidden, hidden)
        lp["ao_w"], lp["ao_b"] = _dense_params(lk[3], hidden, hidden)
        lp["a_ln_g"] = jnp.ones((hidden,), jnp.float32)
        lp["a_ln_b"] = jnp.zeros((hidden,), jnp.float32)
        lp["i_w"], lp["i_b"] = _dense_params(lk[4], hidden, intermediate)
        lp["o_w"], lp["o_b"] = _dense_params(lk[5], intermediate, hidden)
        lp["o_ln_g"] = jnp.ones((hidden,), jnp.float32)
        lp["o_ln_b"] = jnp.zeros((hidden,), jnp.float32)
        p["layers"].append(lp)
    p["cls_w"], p["cls_b"] = _dense_params(keys[3], hidden, num_out)
    return p


def fuse_bert_params(p, heads):
    """Pack per-layer weights into stacked, kernel-ready arrays.

    - Q/K/V weights+biases concatenated to (H, 3H)/(3H,); 1/sqrt(Dh) folded into Q.
    - MXU weight matrices stored in bf16 (f32 accumulation in-kernel); biases and
      LayerNorm parameters kept in f32.
    """
    H = p["emb_ln_g"].shape[0]
    L = len(p["layers"])
    I = p["layers"][0]["i_w"].shape[1]
    scale = 1.0 / math.sqrt(H // heads)
    stack = lambda fn: jnp.stack([fn(lp) for lp in p["layers"]])
    return {
        "word_emb": p["word_emb"],
        "pos_emb": p["pos_emb"],
        "type_emb": p["type_emb"],
        "emb_ln_g": p["emb_ln_g"].reshape(1, H),
        "emb_ln_b": p["emb_ln_b"].reshape(1, H),
        "qkv_w": stack(lambda lp: jnp.concatenate(
            [lp["q_w"] * scale, lp["k_w"], lp["v_w"]], axis=1)).astype(jnp.bfloat16),
        "qkv_b": stack(lambda lp: jnp.concatenate(
            [lp["q_b"] * scale, lp["k_b"], lp["v_b"]], axis=0)).reshape(L, 1, 3 * H),
        "ao_w": stack(lambda lp: lp["ao_w"]).astype(jnp.bfloat16),
        "ao_b": stack(lambda lp: lp["ao_b"]).reshape(L, 1, H),
        "a_ln_g": stack(lambda lp: lp["a_ln_g"]).reshape(L, 1, H),
        "a_ln_b": stack(lambda lp: lp["a_ln_b"]).reshape(L, 1, H),
        "i_w": stack(lambda lp: lp["i_w"]).astype(jnp.bfloat16),
        "i_b": stack(lambda lp: lp["i_b"]).reshape(L, 1, I),
        "o_w": stack(lambda lp: lp["o_w"]).astype(jnp.bfloat16),
        "o_b": stack(lambda lp: lp["o_b"]).reshape(L, 1, H),
        "o_ln_g": stack(lambda lp: lp["o_ln_g"]).reshape(L, 1, H),
        "o_ln_b": stack(lambda lp: lp["o_ln_b"]).reshape(L, 1, H),
        "cls_w": p["cls_w"],
        "cls_b": p["cls_b"],
    }


# ------------------------------ COBERT forward ------------------------------ #

def cobert_forward(qt, qb, heads, QT_input_ids,
                   QT_token_type_ids=None, QT_attention_masks=None):
    B, S = QT_input_ids.shape
    H = qt["word_emb"].shape[1]
    if QT_token_type_ids is None:
        QT_token_type_ids = jnp.zeros((B, S), jnp.int32)
    if QT_attention_masks is None:
        QT_attention_masks = jnp.ones((B, S), jnp.float32)

    # ---- QT_BERT: embedding gathers (XLA glue) -> fused Pallas encoder ----
    emb = (qt["word_emb"][QT_input_ids]
           + qt["pos_emb"][jnp.arange(S)][None, :, :]
           + qt["type_emb"][QT_token_type_ids]).astype(jnp.float32)   # (B, S, H)
    add_mask = ((1.0 - QT_attention_masks.astype(jnp.float32))
                * -10000.0).reshape(B, 1, S)
    x = encoder_forward(emb, add_mask, qt, heads)          # (B, S, H)
    pooled = x[:, 0, :]                                    # hidden_states[-1][:, 0]
    # NOTE: the QT pooler + sequence-classification logits are computed-but-unused
    # in the PyTorch forward's return value, so they are not materialized here.

    # ---- QB_BERT on inputs_embeds = pooled.unsqueeze(0): batch=1, seq=B ----
    qb_S = B
    qb_emb = (pooled
              + qb["pos_emb"][:qb_S]
              + qb["type_emb"][0][None, :]).astype(jnp.float32).reshape(1, qb_S, H)
    qb_mask = jnp.zeros((1, 1, qb_S), jnp.float32)         # no attention mask
    y = encoder_forward(qb_emb, qb_mask, qb, heads)        # (1, qb_S, H)

    # Token-classification head (num_labels=1, dropout = identity at inference):
    # an N=1 output is a fully-masked 1-lane store as a Pallas kernel, so it is
    # left to XLA (per review).  Equals QB logits.squeeze(0) -> (B, 1).
    return jnp.dot(y[0], qb["cls_w"]) + qb["cls_b"]


# TODO(synk): checkpoint loading via from_pretrained has no Pallas equivalent;
# parameters are initialized deterministically in-script instead.

if __name__ == "__main__":
    B, S = 2, 8
    cfg = dict(hidden=32, heads=2, intermediate=64, layers=2,
               vocab=100, max_pos=64, type_vocab=2)

    root = jax.random.PRNGKey(0)
    k_qt, k_qb, k_ids = jax.random.split(root, 3)

    qt_raw = init_bert_params(
        k_qt, vocab=cfg["vocab"], hidden=cfg["hidden"], layers=cfg["layers"],
        intermediate=cfg["intermediate"], max_pos=cfg["max_pos"],
        type_vocab=cfg["type_vocab"], num_out=3)      # QT head unused in forward
    qb_raw = init_bert_params(
        k_qb, vocab=cfg["vocab"], hidden=cfg["hidden"], layers=cfg["layers"],
        intermediate=cfg["intermediate"], max_pos=cfg["max_pos"],
        type_vocab=cfg["type_vocab"], num_out=1)      # token classifier, num_labels=1

    qt = fuse_bert_params(qt_raw, cfg["heads"])
    qb = fuse_bert_params(qb_raw, cfg["heads"])

    QT_input_ids = jax.random.randint(k_ids, (B, S), 0, cfg["vocab"], dtype=jnp.int32)
    QT_token_type_ids = jnp.zeros((B, S), jnp.int32)
    QT_attention_masks = jnp.ones((B, S), jnp.int32)

    forward = jax.jit(functools.partial(cobert_forward, qt, qb, cfg["heads"]))
    out = forward(QT_input_ids, QT_token_type_ids, QT_attention_masks)
    out = jax.block_until_ready(out)
    assert out.shape == (B, 1) and out.dtype == jnp.float32
    print("KERNEL_OK")
</pallas_src>

<mosaic_0001>
module attributes {stable_mosaic.version = 11 : i64} {
  func.func @_encoder_kernel(%arg0: i32, %arg1: i32, %arg2: memref<1x8x32xf32, #tpu.memory_space<vmem>>, %arg3: memref<1x1x8xf32, #tpu.memory_space<vmem>>, %arg4: memref<1x32xf32, #tpu.memory_space<vmem>>, %arg5: memref<1x32xf32, #tpu.memory_space<vmem>>, %arg6: memref<1x32x96xbf16, #tpu.memory_space<vmem>>, %arg7: memref<1x1x96xf32, #tpu.memory_space<vmem>>, %arg8: memref<1x32x32xbf16, #tpu.memory_space<vmem>>, %arg9: memref<1x1x32xf32, #tpu.memory_space<vmem>>, %arg10: memref<1x1x32xf32, #tpu.memory_space<vmem>>, %arg11: memref<1x1x32xf32, #tpu.memory_space<vmem>>, %arg12: memref<1x32x64xbf16, #tpu.memory_space<vmem>>, %arg13: memref<1x1x64xf32, #tpu.memory_space<vmem>>, %arg14: memref<1x64x32xbf16, #tpu.memory_space<vmem>>, %arg15: memref<1x1x32xf32, #tpu.memory_space<vmem>>, %arg16: memref<1x1x32xf32, #tpu.memory_space<vmem>>, %arg17: memref<1x1x32xf32, #tpu.memory_space<vmem>>, %arg18: memref<1x8x32xf32, #tpu.memory_space<vmem>>, %arg19: memref<2x8x32xf32, #tpu.memory_space<vmem>>) attributes {dimension_semantics = [#tpu.dimension_semantics<arbitrary>, #tpu.dimension_semantics<parallel>], iteration_bounds = array<i64: 2, 2>, scalar_prefetch = 0 : i64, scratch_operands = 1 : i64, tpu.core_type = #tpu.core_type<tc>, window_params = [{transform_indices = @transform_0, window_bounds = array<i64: 1, 8, 32>}, {transform_indices = @transform_1, window_bounds = array<i64: 1, 1, 8>}, {pipeline_mode = #tpu.pipeline_mode<synchronous>, transform_indices = @transform_2, window_bounds = array<i64: 1, 32>}, {pipeline_mode = #tpu.pipeline_mode<synchronous>, transform_indices = @transform_3, window_bounds = array<i64: 1, 32>}, {transform_indices = @transform_4, window_bounds = array<i64: 1, 32, 96>}, {transform_indices = @transform_5, window_bounds = array<i64: 1, 1, 96>}, {transform_indices = @transform_6, window_bounds = array<i64: 1, 32, 32>}, {transform_indices = @transform_7, window_bounds = array<i64: 1, 1, 32>}, {transform_indices = @transform_8, window_bounds = array<i64: 1, 1, 32>}, {transform_indices = @transform_9, window_bounds = array<i64: 1, 1, 32>}, {transform_indices = @transform_10, window_bounds = array<i64: 1, 32, 64>}, {transform_indices = @transform_11, window_bounds = array<i64: 1, 1, 64>}, {transform_indices = @transform_12, window_bounds = array<i64: 1, 64, 32>}, {transform_indices = @transform_13, window_bounds = array<i64: 1, 1, 32>}, {transform_indices = @transform_14, window_bounds = array<i64: 1, 1, 32>}, {transform_indices = @transform_15, window_bounds = array<i64: 1, 1, 32>}, {transform_indices = @transform_16, window_bounds = array<i64: 1, 8, 32>}]} {
    %c0_i32 = arith.constant 0 : i32
    %0 = arith.cmpi eq, %arg0, %c0_i32 : i32
    %1 = arith.extui %0 : i1 to i32
    %c0_i32_0 = arith.constant 0 : i32
    %2 = arith.cmpi ne, %1, %c0_i32_0 : i32
    scf.if %2 {
      %c0_79 = arith.constant 0 : index
      %c0_80 = arith.constant 0 : index
      %c0_81 = arith.constant 0 : index
      %177 = vector.load %arg2[%c0_79, %c0_80, %c0_81] : memref<1x8x32xf32, #tpu.memory_space<vmem>>, vector<1x8x32xf32>
      %178 = vector.shape_cast %177 : vector<1x8x32xf32> to vector<8x32xf32>
      %c0_82 = arith.constant 0 : index
      %c0_83 = arith.constant 0 : index
      %179 = vector.load %arg4[%c0_82, %c0_83] : memref<1x32xf32, #tpu.memory_space<vmem>>, vector<1x32xf32>
      %c0_84 = arith.constant 0 : index
      %c0_85 = arith.constant 0 : index
      %180 = vector.load %arg5[%c0_84, %c0_85] : memref<1x32xf32, #tpu.memory_space<vmem>>, vector<1x32xf32>
      %cst_86 = arith.constant dense<0.000000e+00> : vector<8xf32>
      %181 = vector.multi_reduction <add>, %178, %cst_86 [1] : vector<8x32xf32> to vector<8xf32>
      %182 = vector.shape_cast %181 : vector<8xf32> to vector<8x1xf32>
      %cst_87 = arith.constant 3.200000e+01 : f32
      %183 = vector.broadcast %cst_87 : f32 to vector<8x1xf32>
      %184 = arith.divf %182, %183 : vector<8x1xf32>
      %185 = vector.broadcast %184 : vector<8x1xf32> to vector<8x32xf32>
      %186 = arith.subf %178, %185 : vector<8x32xf32>
      %187 = arith.mulf %186, %186 : vector<8x32xf32>
      %cst_88 = arith.constant dense<0.000000e+00> : vector<8xf32>
      %188 = vector.multi_reduction <add>, %187, %cst_88 [1] : vector<8x32xf32> to vector<8xf32>
      %189 = vector.shape_cast %188 : vector<8xf32> to vector<8x1xf32>
      %cst_89 = arith.constant 3.200000e+01 : f32
      %190 = vector.broadcast %cst_89 : f32 to vector<8x1xf32>
      %191 = arith.divf %189, %190 : vector<8x1xf32>
      %cst_90 = arith.constant 9.99999996E-13 : f32
      %192 = vector.broadcast %cst_90 : f32 to vector<8x1xf32>
      %193 = arith.addf %191, %192 : vector<8x1xf32>
      %194 = math.rsqrt %193 : vector<8x1xf32>
      %195 = vector.broadcast %194 : vector<8x1xf32> to vector<8x32xf32>
      %196 = arith.mulf %186, %195 : vector<8x32xf32>
      %197 = vector.broadcast %179 : vector<1x32xf32> to vector<8x32xf32>
      %198 = arith.mulf %196, %197 : vector<8x32xf32>
      %199 = vector.broadcast %180 : vector<1x32xf32> to vector<8x32xf32>
      %200 = arith.addf %198, %199 : vector<8x32xf32>
      %201 = arith.index_cast %arg1 : i32 to index
      %c0_91 = arith.constant 0 : index
      %c0_92 = arith.constant 0 : index
      %202 = vector.load %arg19[%201, %c0_91, %c0_92] : memref<2x8x32xf32, #tpu.memory_space<vmem>>, vector<1x8x32xf32>
      %203 = vector.shape_cast %202 : vector<1x8x32xf32> to vector<8x32xf32>
      %204 = vector.shape_cast %200 : vector<8x32xf32> to vector<1x8x32xf32>
      tpu.vector_store %arg19[%201, %c0_91, %c0_92], %204 {strides = array<i32>} : memref<2x8x32xf32, #tpu.memory_space<vmem>>, vector<1x8x32xf32>,
    } else {
    }
    %3 = arith.index_cast %arg1 : i32 to index
    %c0 = arith.constant 0 : index
    %c0_1 = arith.constant 0 : index
    %4 = vector.load %arg19[%3, %c0, %c0_1] : memref<2x8x32xf32, #tpu.memory_space<vmem>>, vector<1x8x32xf32>
    %5 = vector.shape_cast %4 : vector<1x8x32xf32> to vector<8x32xf32>
    %6 = arith.truncf %5 : vector<8x32xf32> to vector<8x32xbf16>
    %c0_2 = arith.constant 0 : index
    %c0_3 = arith.constant 0 : index
    %c0_4 = arith.constant 0 : index
    %7 = vector.load %arg6[%c0_2, %c0_3, %c0_4] : memref<1x32x96xbf16, #tpu.memory_space<vmem>>, vector<1x32x96xbf16>
    %8 = vector.shape_cast %7 : vector<1x32x96xbf16> to vector<32x96xbf16>
    %cst = arith.constant dense<0.000000e+00> : vector<8x96xf32>
    %9 = tpu.matmul %6, %8, %cst {dimension_numbers = #tpu.dot_dimension_numbers<[1], [0], [0], [1], [0, 0, 1, 1], [], []>} : vector<8x32xbf16>, vector<32x96xbf16>, vector<8x96xf32> -> vector<8x96xf32>
    %c0_5 = arith.constant 0 : index
    %c0_6 = arith.constant 0 : index
    %c0_7 = arith.constant 0 : index
    %10 = vector.load %arg7[%c0_5, %c0_6, %c0_7] : memref<1x1x96xf32, #tpu.memory_space<vmem>>, vector<1x1x96xf32>
    %11 = vector.shape_cast %10 : vector<1x1x96xf32> to vector<1x96xf32>
    %12 = vector.broadcast %11 : vector<1x96xf32> to vector<8x96xf32>
    %13 = arith.addf %9, %12 : vector<8x96xf32>
    %14 = arith.truncf %13 : vector<8x96xf32> to vector<8x96xbf16>
    %15 = vector.extract_strided_slice %14 {offsets = [0, 0], sizes = [8, 16], strides = [1, 1]} : vector<8x96xbf16> to vector<8x16xbf16>
    %16 = vector.extract_strided_slice %14 {offsets = [0, 16], sizes = [8, 16], strides = [1, 1]} : vector<8x96xbf16> to vector<8x16xbf16>
    %17 = vector.shape_cast %15 : vector<8x16xbf16> to vector<1x8x16xbf16>
    %18 = vector.shape_cast %16 : vector<8x16xbf16> to vector<1x8x16xbf16>
    %19 = tpu.concatenate %17, %18 in 0 : vector<1x8x16xbf16>, vector<1x8x16xbf16> -> vector<2x8x16xbf16>
    %20 = vector.extract_strided_slice %14 {offsets = [0, 32], sizes = [8, 16], strides = [1, 1]} : vector<8x96xbf16> to vector<8x16xbf16>
    %21 = vector.extract_strided_slice %14 {offsets = [0, 48], sizes = [8, 16], strides = [1, 1]} : vector<8x96xbf16> to vector<8x16xbf16>
    %22 = vector.shape_cast %20 : vector<8x16xbf16> to vector<1x8x16xbf16>
    %23 = vector.shape_cast %21 : vector<8x16xbf16> to vector<1x8x16xbf16>
    %24 = tpu.concatenate %22, %23 in 0 : vector<1x8x16xbf16>, vector<1x8x16xbf16> -> vector<2x8x16xbf16>
    %25 = vector.extract_strided_slice %14 {offsets = [0, 64], sizes = [8, 16], strides = [1, 1]} : vector<8x96xbf16> to vector<8x16xbf16>
    %26 = vector.extract_strided_slice %14 {offsets = [0, 80], sizes = [8, 16], strides = [1, 1]} : vector<8x96xbf16> to vector<8x16xbf16>
    %27 = vector.shape_cast %25 : vector<8x16xbf16> to vector<1x8x16xbf16>
    %28 = vector.shape_cast %26 : vector<8x16xbf16> to vector<1x8x16xbf16>
    %29 = tpu.concatenate %27, %28 in 0 : vector<1x8x16xbf16>, vector<1x8x16xbf16> -> vector<2x8x16xbf16>
    "tpu.trace_start"() <{level = 10 : i32, message = "hqd,hkd->hqk"}> : () -> ()
    %cst_8 = arith.constant dense<0.000000e+00> : vector<2x8x8xf32>
    %30 = tpu.matmul %19, %24, %cst_8 {dimension_numbers = #tpu.dot_dimension_numbers<[2], [2], [1], [1], [0, 0, 0, 1, 1, 1], [0], [0]>} : vector<2x8x16xbf16>, vector<2x8x16xbf16>, vector<2x8x8xf32> -> vector<2x8x8xf32>
    "tpu.trace_stop"() : () -> ()
    %c0_9 = arith.constant 0 : index
    %c0_10 = arith.constant 0 : index
    %c0_11 = arith.constant 0 : index
    %31 = vector.load %arg3[%c0_9, %c0_10, %c0_11] : memref<1x1x8xf32, #tpu.memory_space<vmem>>, vector<1x1x8xf32>
    %32 = vector.shape_cast %31 : vector<1x1x8xf32> to vector<1x8xf32>
    %33 = vector.shape_cast %32 : vector<1x8xf32> to vector<1x1x8xf32>
    %34 = vector.broadcast %33 : vector<1x1x8xf32> to vector<2x8x8xf32>
    %35 = arith.addf %30, %34 : vector<2x8x8xf32>
    %cst_12 = arith.constant dense<0xFF800000> : vector<2x8xf32>
    %36 = vector.multi_reduction <maximumf>, %35, %cst_12 [2] : vector<2x8x8xf32> to vector<2x8xf32>
    %37 = vector.shape_cast %36 : vector<2x8xf32> to vector<2x8x1xf32>
    %38 = vector.broadcast %37 : vector<2x8x1xf32> to vector<2x8x8xf32>
    %39 = arith.subf %35, %38 : vector<2x8x8xf32>
    %40 = math.exp %39 : vector<2x8x8xf32>
    %cst_13 = arith.constant dense<0.000000e+00> : vector<2x8xf32>
    %41 = vector.multi_reduction <add>, %40, %cst_13 [2] : vector<2x8x8xf32> to vector<2x8xf32>
    %42 = vector.shape_cast %41 : vector<2x8xf32> to vector<2x8x1xf32>
    %43 = tpu.reciprocal %42 {approx = true} : vector<2x8x1xf32> -> vector<2x8x1xf32>
    %44 = vector.broadcast %43 : vector<2x8x1xf32> to vector<2x8x8xf32>
    %45 = arith.mulf %40, %44 : vector<2x8x8xf32>
    %46 = arith.truncf %45 : vector<2x8x8xf32> to vector<2x8x8xbf16>
    "tpu.trace_start"() <{level = 10 : i32, message = "hqk,hkd->hqd"}> : () -> ()
    %cst_14 = arith.constant dense<0.000000e+00> : vector<2x8x16xf32>
    %47 = tpu.matmul %46, %29, %cst_14 {dimension_numbers = #tpu.dot_dimension_numbers<[2], [1], [1], [2], [0, 0, 0, 1, 1, 2], [0], [0]>} : vector<2x8x8xbf16>, vector<2x8x16xbf16>, vector<2x8x16xf32> -> vector<2x8x16xf32>
    "tpu.trace_stop"() : () -> ()
    %48 = arith.truncf %47 : vector<2x8x16xf32> to vector<2x8x16xbf16>
    %c0_15 = arith.constant 0 : index
    %c0_16 = arith.constant 0 : index
    %c0_17 = arith.constant 0 : index
    %49 = vector.load %arg8[%c0_15, %c0_16, %c0_17] : memref<1x32x32xbf16, #tpu.memory_space<vmem>>, vector<1x32x32xbf16>
    %50 = vector.shape_cast %49 : vector<1x32x32xbf16> to vector<32x32xbf16>
    %51 = vector.extract_strided_slice %48 {offsets = [0, 0, 0], sizes = [1, 8, 16], strides = [1, 1, 1]} : vector<2x8x16xbf16> to vector<1x8x16xbf16>
    %52 = vector.shape_cast %51 : vector<1x8x16xbf16> to vector<8x16xbf16>
    %53 = vector.extract_strided_slice %50 {offsets = [0, 0], sizes = [16, 32], strides = [1, 1]} : vector<32x32xbf16> to vector<16x32xbf16>
    %cst_18 = arith.constant dense<0.000000e+00> : vector<8x32xf32>
    %54 = tpu.matmul %52, %53, %cst_18 {dimension_numbers = #tpu.dot_dimension_numbers<[1], [0], [0], [1], [0, 0, 1, 1], [], []>} : vector<8x16xbf16>, vector<16x32xbf16>, vector<8x32xf32> -> vector<8x32xf32>
    %55 = vector.extract_strided_slice %48 {offsets = [1, 0, 0], sizes = [1, 8, 16], strides = [1, 1, 1]} : vector<2x8x16xbf16> to vector<1x8x16xbf16>
    %56 = vector.shape_cast %55 : vector<1x8x16xbf16> to vector<8x16xbf16>
    %57 = vector.extract_strided_slice %50 {offsets = [16, 0], sizes = [16, 32], strides = [1, 1]} : vector<32x32xbf16> to vector<16x32xbf16>
    %cst_19 = arith.constant dense<0.000000e+00> : vector<8x32xf32>
    %58 = tpu.matmul %56, %57, %cst_19 {dimension_numbers = #tpu.dot_dimension_numbers<[1], [0], [0], [1], [0, 0, 1, 1], [], []>} : vector<8x16xbf16>, vector<16x32xbf16>, vector<8x32xf32> -> vector<8x32xf32>
    %59 = arith.addf %54, %58 : vector<8x32xf32>
    %c0_20 = arith.constant 0 : index
    %c0_21 = arith.constant 0 : index
    %c0_22 = arith.constant 0 : index
    %60 = vector.load %arg9[%c0_20, %c0_21, %c0_22] : memref<1x1x32xf32, #tpu.memory_space<vmem>>, vector<1x1x32xf32>
    %61 = vector.shape_cast %60 : vector<1x1x32xf32> to vector<1x32xf32>
    %62 = vector.broadcast %61 : vector<1x32xf32> to vector<8x32xf32>
    %63 = arith.addf %59, %62 : vector<8x32xf32>
    %64 = arith.addf %63, %5 : vector<8x32xf32>
    %c0_23 = arith.constant 0 : index
    %c0_24 = arith.constant 0 : index
    %c0_25 = arith.constant 0 : index
    %65 = vector.load %arg10[%c0_23, %c0_24, %c0_25] : memref<1x1x32xf32, #tpu.memory_space<vmem>>, vector<1x1x32xf32>
    %66 = vector.shape_cast %65 : vector<1x1x32xf32> to vector<1x32xf32>
    %c0_26 = arith.constant 0 : index
    %c0_27 = arith.constant 0 : index
    %c0_28 = arith.constant 0 : index
    %67 = vector.load %arg11[%c0_26, %c0_27, %c0_28] : memref<1x1x32xf32, #tpu.memory_space<vmem>>, vector<1x1x32xf32>
    %68 = vector.shape_cast %67 : vector<1x1x32xf32> to vector<1x32xf32>
    %cst_29 = arith.constant dense<0.000000e+00> : vector<8xf32>
    %69 = vector.multi_reduction <add>, %64, %cst_29 [1] : vector<8x32xf32> to vector<8xf32>
    %70 = vector.shape_cast %69 : vector<8xf32> to vector<8x1xf32>
    %cst_30 = arith.constant 3.200000e+01 : f32
    %71 = vector.broadcast %cst_30 : f32 to vector<8x1xf32>
    %72 = arith.divf %70, %71 : vector<8x1xf32>
    %73 = vector.broadcast %72 : vector<8x1xf32> to vector<8x32xf32>
    %74 = arith.subf %64, %73 : vector<8x32xf32>
    %75 = arith.mulf %74, %74 : vector<8x32xf32>
    %cst_31 = arith.constant dense<0.000000e+00> : vector<8xf32>
    %76 = vector.multi_reduction <add>, %75, %cst_31 [1] : vector<8x32xf32> to vector<8xf32>
    %77 = vector.shape_cast %76 : vector<8xf32> to vector<8x1xf32>
    %cst_32 = arith.constant 3.200000e+01 : f32
    %78 = vector.broadcast %cst_32 : f32 to vector<8x1xf32>
    %79 = arith.divf %77, %78 : vector<8x1xf32>
    %cst_33 = arith.constant 9.99999996E-13 : f32
    %80 = vector.broadcast %cst_33 : f32 to vector<8x1xf32>
    %81 = arith.addf %79, %80 : vector<8x1xf32>
    %82 = math.rsqrt %81 : vector<8x1xf32>
    %83 = vector.broadcast %82 : vector<8x1xf32> to vector<8x32xf32>
    %84 = arith.mulf %74, %83 : vector<8x32xf32>
    %85 = vector.broadcast %66 : vector<1x32xf32> to vector<8x32xf32>
    %86 = arith.mulf %84, %85 : vector<8x32xf32>
    %87 = vector.broadcast %68 : vector<1x32xf32> to vector<8x32xf32>
    %88 = arith.addf %86, %87 : vector<8x32xf32>
    %89 = arith.truncf %88 : vector<8x32xf32> to vector<8x32xbf16>
    %c0_34 = arith.constant 0 : index
    %c0_35 = arith.constant 0 : index
    %c0_36 = arith.constant 0 : index
    %90 = vector.load %arg12[%c0_34, %c0_35, %c0_36] : memref<1x32x64xbf16, #tpu.memory_space<vmem>>, vector<1x32x64xbf16>
    %91 = vector.shape_cast %90 : vector<1x32x64xbf16> to vector<32x64xbf16>
    %cst_37 = arith.constant dense<0.000000e+00> : vector<8x64xf32>
    %92 = tpu.matmul %89, %91, %cst_37 {dimension_numbers = #tpu.dot_dimension_numbers<[1], [0], [0], [1], [0, 0, 1, 1], [], []>} : vector<8x32xbf16>, vector<32x64xbf16>, vector<8x64xf32> -> vector<8x64xf32>
    %c0_38 = arith.constant 0 : index
    %c0_39 = arith.constant 0 : index
    %c0_40 = arith.constant 0 : index
    %93 = vector.load %arg13[%c0_38, %c0_39, %c0_40] : memref<1x1x64xf32, #tpu.memory_space<vmem>>, vector<1x1x64xf32>
    %94 = vector.shape_cast %93 : vector<1x1x64xf32> to vector<1x64xf32>
    %95 = vector.broadcast %94 : vector<1x64xf32> to vector<8x64xf32>
    %96 = arith.addf %92, %95 : vector<8x64xf32>
    %cst_41 = arith.constant 5.000000e-01 : f32
    %97 = vector.broadcast %cst_41 : f32 to vector<8x64xf32>
    %98 = arith.mulf %97, %96 : vector<8x64xf32>
    %cst_42 = arith.constant 0.707106769 : f32
    %99 = vector.broadcast %cst_42 : f32 to vector<8x64xf32>
    %100 = arith.mulf %96, %99 : vector<8x64xf32>
    %cst_43 = arith.constant 0.000000e+00 : f32
    %101 = vector.broadcast %cst_43 : f32 to vector<8x64xf32>
    %102 = arith.cmpf oge, %100, %101 : vector<8x64xf32>
    %cst_44 = arith.constant 1.000000e+00 : f32
    %cst_45 = arith.constant -1.000000e+00 : f32
    %103 = vector.broadcast %cst_44 : f32 to vector<8x64xf32>
    %104 = vector.broadcast %cst_45 : f32 to vector<8x64xf32>
    %105 = arith.select %102, %103, %104 : vector<8x64xi1>, vector<8x64xf32>
    %106 = math.absf %100 : vector<8x64xf32>
    %cst_46 = arith.constant 0.327591091 : f32
    %107 = vector.broadcast %cst_46 : f32 to vector<8x64xf32>
    %108 = arith.mulf %107, %106 : vector<8x64xf32>
    %cst_47 = arith.constant 1.000000e+00 : f32
    %109 = vector.broadcast %cst_47 : f32 to vector<8x64xf32>
    %110 = arith.addf %109, %108 : vector<8x64xf32>
    %111 = tpu.reciprocal %110 : vector<8x64xf32> -> vector<8x64xf32>
    %cst_48 = arith.constant 1.06140542 : f32
    %112 = vector.broadcast %cst_48 : f32 to vector<8x64xf32>
    %113 = arith.mulf %112, %111 : vector<8x64xf32>
    %cst_49 = arith.constant -1.45315206 : f32
    %114 = vector.broadcast %cst_49 : f32 to vector<8x64xf32>
    %115 = arith.addf %113, %114 : vector<8x64xf32>
    %116 = arith.mulf %115, %111 : vector<8x64xf32>
    %cst_50 = arith.constant 1.42141378 : f32
    %117 = vector.broadcast %cst_50 : f32 to vector<8x64xf32>
    %118 = arith.addf %116, %117 : vector<8x64xf32>
    %119 = arith.mulf %118, %111 : vector<8x64xf32>
    %cst_51 = arith.constant -0.284496725 : f32
    %120 = vector.broadcast %cst_51 : f32 to vector<8x64xf32>
    %121 = arith.addf %119, %120 : vector<8x64xf32>
    %122 = arith.mulf %121, %111 : vector<8x64xf32>
    %cst_52 = arith.constant 0.254829586 : f32
    %123 = vector.broadcast %cst_52 : f32 to vector<8x64xf32>
    %124 = arith.addf %122, %123 : vector<8x64xf32>
    %125 = arith.mulf %124, %111 : vector<8x64xf32>
    %cst_53 = arith.constant 0.000000e+00 : f32
    %126 = vector.broadcast %cst_53 : f32 to vector<8x64xf32>
    %127 = arith.subf %126, %106 : vector<8x64xf32>
    %128 = arith.mulf %127, %106 : vector<8x64xf32>
    %129 = math.exp %128 : vector<8x64xf32>
    %130 = arith.mulf %125, %129 : vector<8x64xf32>
    %cst_54 = arith.constant 1.000000e+00 : f32
    %131 = vector.broadcast %cst_54 : f32 to vector<8x64xf32>
    %132 = arith.subf %131, %130 : vector<8x64xf32>
    %133 = arith.mulf %105, %132 : vector<8x64xf32>
    %cst_55 = arith.constant 1.000000e+00 : f32
    %134 = vector.broadcast %cst_55 : f32 to vector<8x64xf32>
    %135 = arith.addf %134, %133 : vector<8x64xf32>
    %136 = arith.mulf %98, %135 : vector<8x64xf32>
    %137 = arith.truncf %136 : vector<8x64xf32> to vector<8x64xbf16>
    %c0_56 = arith.constant 0 : index
    %c0_57 = arith.constant 0 : index
    %c0_58 = arith.constant 0 : index
    %138 = vector.load %arg14[%c0_56, %c0_57, %c0_58] : memref<1x64x32xbf16, #tpu.memory_space<vmem>>, vector<1x64x32xbf16>
    %139 = vector.shape_cast %138 : vector<1x64x32xbf16> to vector<64x32xbf16>
    %cst_59 = arith.constant dense<0.000000e+00> : vector<8x32xf32>
    %140 = tpu.matmul %137, %139, %cst_59 {dimension_numbers = #tpu.dot_dimension_numbers<[1], [0], [0], [1], [0, 0, 1, 1], [], []>} : vector<8x64xbf16>, vector<64x32xbf16>, vector<8x32xf32> -> vector<8x32xf32>
    %c0_60 = arith.constant 0 : index
    %c0_61 = arith.constant 0 : index
    %c0_62 = arith.constant 0 : index
    %141 = vector.load %arg15[%c0_60, %c0_61, %c0_62] : memref<1x1x32xf32, #tpu.memory_space<vmem>>, vector<1x1x32xf32>
    %142 = vector.shape_cast %141 : vector<1x1x32xf32> to vector<1x32xf32>
    %143 = vector.broadcast %142 : vector<1x32xf32> to vector<8x32xf32>
    %144 = arith.addf %140, %143 : vector<8x32xf32>
    %145 = arith.addf %144, %88 : vector<8x32xf32>
    %c0_63 = arith.constant 0 : index
    %c0_64 = arith.constant 0 : index
    %c0_65 = arith.constant 0 : index
    %146 = vector.load %arg16[%c0_63, %c0_64, %c0_65] : memref<1x1x32xf32, #tpu.memory_space<vmem>>, vector<1x1x32xf32>
    %147 = vector.shape_cast %146 : vector<1x1x32xf32> to vector<1x32xf32>
    %c0_66 = arith.constant 0 : index
    %c0_67 = arith.constant 0 : index
    %c0_68 = arith.constant 0 : index
    %148 = vector.load %arg17[%c0_66, %c0_67, %c0_68] : memref<1x1x32xf32, #tpu.memory_space<vmem>>, vector<1x1x32xf32>
    %149 = vector.shape_cast %148 : vector<1x1x32xf32> to vector<1x32xf32>
    %cst_69 = arith.constant dense<0.000000e+00> : vector<8xf32>
    %150 = vector.multi_reduction <add>, %145, %cst_69 [1] : vector<8x32xf32> to vector<8xf32>
    %151 = vector.shape_cast %150 : vector<8xf32> to vector<8x1xf32>
    %cst_70 = arith.constant 3.200000e+01 : f32
    %152 = vector.broadcast %cst_70 : f32 to vector<8x1xf32>
    %153 = arith.divf %151, %152 : vector<8x1xf32>
    %154 = vector.broadcast %153 : vector<8x1xf32> to vector<8x32xf32>
    %155 = arith.subf %145, %154 : vector<8x32xf32>
    %156 = arith.mulf %155, %155 : vector<8x32xf32>
    %cst_71 = arith.constant dense<0.000000e+00> : vector<8xf32>
    %157 = vector.multi_reduction <add>, %156, %cst_71 [1] : vector<8x32xf32> to vector<8xf32>
    %158 = vector.shape_cast %157 : vector<8xf32> to vector<8x1xf32>
    %cst_72 = arith.constant 3.200000e+01 : f32
    %159 = vector.broadcast %cst_72 : f32 to vector<8x1xf32>
    %160 = arith.divf %158, %159 : vector<8x1xf32>
    %cst_73 = arith.constant 9.99999996E-13 : f32
    %161 = vector.broadcast %cst_73 : f32 to vector<8x1xf32>
    %162 = arith.addf %160, %161 : vector<8x1xf32>
    %163 = math.rsqrt %162 : vector<8x1xf32>
    %164 = vector.broadcast %163 : vector<8x1xf32> to vector<8x32xf32>
    %165 = arith.mulf %155, %164 : vector<8x32xf32>
    %166 = vector.broadcast %147 : vector<1x32xf32> to vector<8x32xf32>
    %167 = arith.mulf %165, %166 : vector<8x32xf32>
    %168 = vector.broadcast %149 : vector<1x32xf32> to vector<8x32xf32>
    %169 = arith.addf %167, %168 : vector<8x32xf32>
    %170 = arith.index_cast %arg1 : i32 to index
    %c0_74 = arith.constant 0 : index
    %c0_75 = arith.constant 0 : index
    %171 = vector.load %arg19[%170, %c0_74, %c0_75] : memref<2x8x32xf32, #tpu.memory_space<vmem>>, vector<1x8x32xf32>
    %172 = vector.shape_cast %171 : vector<1x8x32xf32> to vector<8x32xf32>
    %173 = vector.shape_cast %169 : vector<8x32xf32> to vector<1x8x32xf32>
    tpu.vector_store %arg19[%170, %c0_74, %c0_75], %173 {strides = array<i32>} : memref<2x8x32xf32, #tpu.memory_space<vmem>>, vector<1x8x32xf32>,
    %c0_76 = arith.constant 0 : index
    %c0_77 = arith.constant 0 : index
    %c0_78 = arith.constant 0 : index
    %174 = vector.load %arg18[%c0_76, %c0_77, %c0_78] : memref<1x8x32xf32, #tpu.memory_space<vmem>>, vector<1x8x32xf32>
    %175 = vector.shape_cast %174 : vector<1x8x32xf32> to vector<8x32xf32>
    %176 = vector.shape_cast %169 : vector<8x32xf32> to vector<1x8x32xf32>
    tpu.vector_store %arg18[%c0_76, %c0_77, %c0_78], %176 {strides = array<i32>} : memref<1x8x32xf32, #tpu.memory_space<vmem>>, vector<1x8x32xf32>,
    return
  }
  func.func @transform_0(%arg0: i32, %arg1: i32) -> (i32, i32, i32) {
    %c0_i32 = arith.constant 0 : i32
    %c0_i32_0 = arith.constant 0 : i32
    %c0_i32_1 = arith.constant 0 : i32
    return %arg1, %c0_i32, %c0_i32_0 : i32, i32, i32
  }
  func.func @transform_1(%arg0: i32, %arg1: i32) -> (i32, i32, i32) {
    %c0_i32 = arith.constant 0 : i32
    %c0_i32_0 = arith.constant 0 : i32
    %c0_i32_1 = arith.constant 0 : i32
    return %arg1, %c0_i32, %c0_i32_0 : i32, i32, i32
  }
  func.func @transform_2(%arg0: i32, %arg1: i32) -> (i32, i32) {
    %c0_i32 = arith.constant 0 : i32
    %c0_i32_0 = arith.constant 0 : i32
    %c0_i32_1 = arith.constant 0 : i32
    return %c0_i32, %c0_i32_0 : i32, i32
  }
  func.func @transform_3(%arg0: i32, %arg1: i32) -> (i32, i32) {
    %c0_i32 = arith.constant 0 : i32
    %c0_i32_0 = arith.constant 0 : i32
    %c0_i32_1 = arith.constant 0 : i32
    return %c0_i32, %c0_i32_0 : i32, i32
  }
  func.func @transform_4(%arg0: i32, %arg1: i32) -> (i32, i32, i32) {
    %c0_i32 = arith.constant 0 : i32
    %c0_i32_0 = arith.constant 0 : i32
    %c0_i32_1 = arith.constant 0 : i32
    return %arg0, %c0_i32, %c0_i32_0 : i32, i32, i32
  }
  func.func @transform_5(%arg0: i32, %arg1: i32) -> (i32, i32, i32) {
    %c0_i32 = arith.constant 0 : i32
    %c0_i32_0 = arith.constant 0 : i32
    %c0_i32_1 = arith.constant 0 : i32
    return %arg0, %c0_i32, %c0_i32_0 : i32, i32, i32
  }
  func.func @transform_6(%arg0: i32, %arg1: i32) -> (i32, i32, i32) {
    %c0_i32 = arith.constant 0 : i32
    %c0_i32_0 = arith.constant 0 : i32
    %c0_i32_1 = arith.constant 0 : i32
    return %arg0, %c0_i32, %c0_i32_0 : i32, i32, i32
  }
  func.func @transform_7(%arg0: i32, %arg1: i32) -> (i32, i32, i32) {
    %c0_i32 = arith.constant 0 : i32
    %c0_i32_0 = arith.constant 0 : i32
    %c0_i32_1 = arith.constant 0 : i32
    return %arg0, %c0_i32, %c0_i32_0 : i32, i32, i32
  }
  func.func @transform_8(%arg0: i32, %arg1: i32) -> (i32, i32, i32) {
    %c0_i32 = arith.constant 0 : i32
    %c0_i32_0 = arith.constant 0 : i32
    %c0_i32_1 = arith.constant 0 : i32
    return %arg0, %c0_i32, %c0_i32_0 : i32, i32, i32
  }
  func.func @transform_9(%arg0: i32, %arg1: i32) -> (i32, i32, i32) {
    %c0_i32 = arith.constant 0 : i32
    %c0_i32_0 = arith.constant 0 : i32
    %c0_i32_1 = arith.constant 0 : i32
    return %arg0, %c0_i32, %c0_i32_0 : i32, i32, i32
  }
  func.func @transform_10(%arg0: i32, %arg1: i32) -> (i32, i32, i32) {
    %c0_i32 = arith.constant 0 : i32
    %c0_i32_0 = arith.constant 0 : i32
    %c0_i32_1 = arith.constant 0 : i32
    return %arg0, %c0_i32, %c0_i32_0 : i32, i32, i32
  }
  func.func @transform_11(%arg0: i32, %arg1: i32) -> (i32, i32, i32) {
    %c0_i32 = arith.constant 0 : i32
    %c0_i32_0 = arith.constant 0 : i32
    %c0_i32_1 = arith.constant 0 : i32
    return %arg0, %c0_i32, %c0_i32_0 : i32, i32, i32
  }
  func.func @transform_12(%arg0: i32, %arg1: i32) -> (i32, i32, i32) {
    %c0_i32 = arith.constant 0 : i32
    %c0_i32_0 = arith.constant 0 : i32
    %c0_i32_1 = arith.constant 0 : i32
    return %arg0, %c0_i32, %c0_i32_0 : i32, i32, i32
  }
  func.func @transform_13(%arg0: i32, %arg1: i32) -> (i32, i32, i32) {
    %c0_i32 = arith.constant 0 : i32
    %c0_i32_0 = arith.constant 0 : i32
    %c0_i32_1 = arith.constant 0 : i32
    return %arg0, %c0_i32, %c0_i32_0 : i32, i32, i32
  }
  func.func @transform_14(%arg0: i32, %arg1: i32) -> (i32, i32, i32) {
    %c0_i32 = arith.constant 0 : i32
    %c0_i32_0 = arith.constant 0 : i32
    %c0_i32_1 = arith.constant 0 : i32
    return %arg0, %c0_i32, %c0_i32_0 : i32, i32, i32
  }
  func.func @transform_15(%arg0: i32, %arg1: i32) -> (i32, i32, i32) {
    %c0_i32 = arith.constant 0 : i32
    %c0_i32_0 = arith.constant 0 : i32
    %c0_i32_1 = arith.constant 0 : i32
    return %arg0, %c0_i32, %c0_i32_0 : i32, i32, i32
  }
  func.func @transform_16(%arg0: i32, %arg1: i32) -> (i32, i32, i32) {
    %c0_i32 = arith.constant 0 : i32
    %c0_i32_0 = arith.constant 0 : i32
    %c0_i32_1 = arith.constant 0 : i32
    return %arg1, %c0_i32, %c0_i32_0 : i32, i32, i32
  }
}

module attributes {stable_mosaic.version = 11 : i64} {
  func.func @_encoder_kernel(%arg0: i32, %arg1: i32, %arg2: memref<1x2x32xf32, #tpu.memory_space<vmem>>, %arg3: memref<1x1x2xf32, #tpu.memory_space<vmem>>, %arg4: memref<1x32xf32, #tpu.memory_space<vmem>>, %arg5: memref<1x32xf32, #tpu.memory_space<vmem>>, %arg6: memref<1x32x96xbf16, #tpu.memory_space<vmem>>, %arg7: memref<1x1x96xf32, #tpu.memory_space<vmem>>, %arg8: memref<1x32x32xbf16, #tpu.memory_space<vmem>>, %arg9: memref<1x1x32xf32, #tpu.memory_space<vmem>>, %arg10: memref<1x1x32xf32, #tpu.memory_space<vmem>>, %arg11: memref<1x1x32xf32, #tpu.memory_space<vmem>>, %arg12: memref<1x32x64xbf16, #tpu.memory_space<vmem>>, %arg13: memref<1x1x64xf32, #tpu.memory_space<vmem>>, %arg14: memref<1x64x32xbf16, #tpu.memory_space<vmem>>, %arg15: memref<1x1x32xf32, #tpu.memory_space<vmem>>, %arg16: memref<1x1x32xf32, #tpu.memory_space<vmem>>, %arg17: memref<1x1x32xf32, #tpu.memory_space<vmem>>, %arg18: memref<1x2x32xf32, #tpu.memory_space<vmem>>, %arg19: memref<1x2x32xf32, #tpu.memory_space<vmem>>) attributes {dimension_semantics = [#tpu.dimension_semantics<arbitrary>, #tpu.dimension_semantics<parallel>], iteration_bounds = array<i64: 2, 1>, scalar_prefetch = 0 : i64, scratch_operands = 1 : i64, tpu.core_type = #tpu.core_type<tc>, window_params = [{transform_indices = @transform_0, window_bounds = array<i64: 1, 2, 32>}, {transform_indices = @transform_1, window_bounds = array<i64: 1, 1, 2>}, {pipeline_mode = #tpu.pipeline_mode<synchronous>, transform_indices = @transform_2, window_bounds = array<i64: 1, 32>}, {pipeline_mode = #tpu.pipeline_mode<synchronous>, transform_indices = @transform_3, window_bounds = array<i64: 1, 32>}, {transform_indices = @transform_4, window_bounds = array<i64: 1, 32, 96>}, {transform_indices = @transform_5, window_bounds = array<i64: 1, 1, 96>}, {transform_indices = @transform_6, window_bounds = array<i64: 1, 32, 32>}, {transform_indices = @transform_7, window_bounds = array<i64: 1, 1, 32>}, {transform_indices = @transform_8, window_bounds = array<i64: 1, 1, 32>}, {transform_indices = @transform_9, window_bounds = array<i64: 1, 1, 32>}, {transform_indices = @transform_10, window_bounds = array<i64: 1, 32, 64>}, {transform_indices = @transform_11, window_bounds = array<i64: 1, 1, 64>}, {transform_indices = @transform_12, window_bounds = array<i64: 1, 64, 32>}, {transform_indices = @transform_13, window_bounds = array<i64: 1, 1, 32>}, {transform_indices = @transform_14, window_bounds = array<i64: 1, 1, 32>}, {transform_indices = @transform_15, window_bounds = array<i64: 1, 1, 32>}, {transform_indices = @transform_16, window_bounds = array<i64: 1, 2, 32>}]} {
    %c0_i32 = arith.constant 0 : i32
    %0 = arith.cmpi eq, %arg0, %c0_i32 : i32
    %1 = arith.extui %0 : i1 to i32
    %c0_i32_0 = arith.constant 0 : i32
    %2 = arith.cmpi ne, %1, %c0_i32_0 : i32
    scf.if %2 {
      %c0_79 = arith.constant 0 : index
      %c0_80 = arith.constant 0 : index
      %c0_81 = arith.constant 0 : index
      %177 = vector.load %arg2[%c0_79, %c0_80, %c0_81] : memref<1x2x32xf32, #tpu.memory_space<vmem>>, vector<1x2x32xf32>
      %178 = vector.shape_cast %177 : vector<1x2x32xf32> to vector<2x32xf32>
      %c0_82 = arith.constant 0 : index
      %c0_83 = arith.constant 0 : index
      %179 = vector.load %arg4[%c0_82, %c0_83] : memref<1x32xf32, #tpu.memory_space<vmem>>, vector<1x32xf32>
      %c0_84 = arith.constant 0 : index
      %c0_85 = arith.constant 0 : index
      %180 = vector.load %arg5[%c0_84, %c0_85] : memref<1x32xf32, #tpu.memory_space<vmem>>, vector<1x32xf32>
      %cst_86 = arith.constant dense<0.000000e+00> : vector<2xf32>
      %181 = vector.multi_reduction <add>, %178, %cst_86 [1] : vector<2x32xf32> to vector<2xf32>
      %182 = vector.shape_cast %181 : vector<2xf32> to vector<2x1xf32>
      %cst_87 = arith.constant 3.200000e+01 : f32
      %183 = vector.broadcast %cst_87 : f32 to vector<2x1xf32>
      %184 = arith.divf %182, %183 : vector<2x1xf32>
      %185 = vector.broadcast %184 : vector<2x1xf32> to vector<2x32xf32>
      %186 = arith.subf %178, %185 : vector<2x32xf32>
      %187 = arith.mulf %186, %186 : vector<2x32xf32>
      %cst_88 = arith.constant dense<0.000000e+00> : vector<2xf32>
      %188 = vector.multi_reduction <add>, %187, %cst_88 [1] : vector<2x32xf32> to vector<2xf32>
      %189 = vector.shape_cast %188 : vector<2xf32> to vector<2x1xf32>
      %cst_89 = arith.constant 3.200000e+01 : f32
      %190 = vector.broadcast %cst_89 : f32 to vector<2x1xf32>
      %191 = arith.divf %189, %190 : vector<2x1xf32>
      %cst_90 = arith.constant 9.99999996E-13 : f32
      %192 = vector.broadcast %cst_90 : f32 to vector<2x1xf32>
      %193 = arith.addf %191, %192 : vector<2x1xf32>
      %194 = math.rsqrt %193 : vector<2x1xf32>
      %195 = vector.broadcast %194 : vector<2x1xf32> to vector<2x32xf32>
      %196 = arith.mulf %186, %195 : vector<2x32xf32>
      %197 = vector.broadcast %179 : vector<1x32xf32> to vector<2x32xf32>
      %198 = arith.mulf %196, %197 : vector<2x32xf32>
      %199 = vector.broadcast %180 : vector<1x32xf32> to vector<2x32xf32>
      %200 = arith.addf %198, %199 : vector<2x32xf32>
      %201 = arith.index_cast %arg1 : i32 to index
      %c0_91 = arith.constant 0 : index
      %c0_92 = arith.constant 0 : index
      %202 = vector.load %arg19[%201, %c0_91, %c0_92] : memref<1x2x32xf32, #tpu.memory_space<vmem>>, vector<1x2x32xf32>
      %203 = vector.shape_cast %202 : vector<1x2x32xf32> to vector<2x32xf32>
      %204 = vector.shape_cast %200 : vector<2x32xf32> to vector<1x2x32xf32>
      tpu.vector_store %arg19[%201, %c0_91, %c0_92], %204 {strides = array<i32>} : memref<1x2x32xf32, #tpu.memory_space<vmem>>, vector<1x2x32xf32>,
    } else {
    }
    %3 = arith.index_cast %arg1 : i32 to index
    %c0 = arith.constant 0 : index
    %c0_1 = arith.constant 0 : index
    %4 = vector.load %arg19[%3, %c0, %c0_1] : memref<1x2x32xf32, #tpu.memory_space<vmem>>, vector<1x2x32xf32>
    %5 = vector.shape_cast %4 : vector<1x2x32xf32> to vector<2x32xf32>
    %6 = arith.truncf %5 : vector<2x32xf32> to vector<2x32xbf16>
    %c0_2 = arith.constant 0 : index
    %c0_3 = arith.constant 0 : index
    %c0_4 = arith.constant 0 : index
    %7 = vector.load %arg6[%c0_2, %c0_3, %c0_4] : memref<1x32x96xbf16, #tpu.memory_space<vmem>>, vector<1x32x96xbf16>
    %8 = vector.shape_cast %7 : vector<1x32x96xbf16> to vector<32x96xbf16>
    %cst = arith.constant dense<0.000000e+00> : vector<2x96xf32>
    %9 = tpu.matmul %6, %8, %cst {dimension_numbers = #tpu.dot_dimension_numbers<[1], [0], [0], [1], [0, 0, 1, 1], [], []>} : vector<2x32xbf16>, vector<32x96xbf16>, vector<2x96xf32> -> vector<2x96xf32>
    %c0_5 = arith.constant 0 : index
    %c0_6 = arith.constant 0 : index
    %c0_7 = arith.constant 0 : index
    %10 = vector.load %arg7[%c0_5, %c0_6, %c0_7] : memref<1x1x96xf32, #tpu.memory_space<vmem>>, vector<1x1x96xf32>
    %11 = vector.shape_cast %10 : vector<1x1x96xf32> to vector<1x96xf32>
    %12 = vector.broadcast %11 : vector<1x96xf32> to vector<2x96xf32>
    %13 = arith.addf %9, %12 : vector<2x96xf32>
    %14 = arith.truncf %13 : vector<2x96xf32> to vector<2x96xbf16>
    %15 = vector.extract_strided_slice %14 {offsets = [0, 0], sizes = [2, 16], strides = [1, 1]} : vector<2x96xbf16> to vector<2x16xbf16>
    %16 = vector.extract_strided_slice %14 {offsets = [0, 16], sizes = [2, 16], strides = [1, 1]} : vector<2x96xbf16> to vector<2x16xbf16>
    %17 = vector.shape_cast %15 : vector<2x16xbf16> to vector<1x2x16xbf16>
    %18 = vector.shape_cast %16 : vector<2x16xbf16> to vector<1x2x16xbf16>
    %19 = tpu.concatenate %17, %18 in 0 : vector<1x2x16xbf16>, vector<1x2x16xbf16> -> vector<2x2x16xbf16>
    %20 = vector.extract_strided_slice %14 {offsets = [0, 32], sizes = [2, 16], strides = [1, 1]} : vector<2x96xbf16> to vector<2x16xbf16>
    %21 = vector.extract_strided_slice %14 {offsets = [0, 48], sizes = [2, 16], strides = [1, 1]} : vector<2x96xbf16> to vector<2x16xbf16>
    %22 = vector.shape_cast %20 : vector<2x16xbf16> to vector<1x2x16xbf16>
    %23 = vector.shape_cast %21 : vector<2x16xbf16> to vector<1x2x16xbf16>
    %24 = tpu.concatenate %22, %23 in 0 : vector<1x2x16xbf16>, vector<1x2x16xbf16> -> vector<2x2x16xbf16>
    %25 = vector.extract_strided_slice %14 {offsets = [0, 64], sizes = [2, 16], strides = [1, 1]} : vector<2x96xbf16> to vector<2x16xbf16>
    %26 = vector.extract_strided_slice %14 {offsets = [0, 80], sizes = [2, 16], strides = [1, 1]} : vector<2x96xbf16> to vector<2x16xbf16>
    %27 = vector.shape_cast %25 : vector<2x16xbf16> to vector<1x2x16xbf16>
    %28 = vector.shape_cast %26 : vector<2x16xbf16> to vector<1x2x16xbf16>
    %29 = tpu.concatenate %27, %28 in 0 : vector<1x2x16xbf16>, vector<1x2x16xbf16> -> vector<2x2x16xbf16>
    "tpu.trace_start"() <{level = 10 : i32, message = "hqd,hkd->hqk"}> : () -> ()
    %cst_8 = arith.constant dense<0.000000e+00> : vector<2x2x2xf32>
    %30 = tpu.matmul %19, %24, %cst_8 {dimension_numbers = #tpu.dot_dimension_numbers<[2], [2], [1], [1], [0, 0, 0, 1, 1, 1], [0], [0]>} : vector<2x2x16xbf16>, vector<2x2x16xbf16>, vector<2x2x2xf32> -> vector<2x2x2xf32>
    "tpu.trace_stop"() : () -> ()
    %c0_9 = arith.constant 0 : index
    %c0_10 = arith.constant 0 : index
    %c0_11 = arith.constant 0 : index
    %31 = vector.load %arg3[%c0_9, %c0_10, %c0_11] : memref<1x1x2xf32, #tpu.memory_space<vmem>>, vector<1x1x2xf32>
    %32 = vector.shape_cast %31 : vector<1x1x2xf32> to vector<1x2xf32>
    %33 = vector.shape_cast %32 : vector<1x2xf32> to vector<1x1x2xf32>
    %34 = vector.broadcast %33 : vector<1x1x2xf32> to vector<2x2x2xf32>
    %35 = arith.addf %30, %34 : vector<2x2x2xf32>
    %cst_12 = arith.constant dense<0xFF800000> : vector<2x2xf32>
    %36 = vector.multi_reduction <maximumf>, %35, %cst_12 [2] : vector<2x2x2xf32> to vector<2x2xf32>
    %37 = vector.shape_cast %36 : vector<2x2xf32> to vector<2x2x1xf32>
    %38 = vector.broadcast %37 : vector<2x2x1xf32> to vector<2x2x2xf32>
    %39 = arith.subf %35, %38 : vector<2x2x2xf32>
    %40 = math.exp %39 : vector<2x2x2xf32>
    %cst_13 = arith.constant dense<0.000000e+00> : vector<2x2xf32>
    %41 = vector.multi_reduction <add>, %40, %cst_13 [2] : vector<2x2x2xf32> to vector<2x2xf32>
    %42 = vector.shape_cast %41 : vector<2x2xf32> to vector<2x2x1xf32>
    %43 = tpu.reciprocal %42 {approx = true} : vector<2x2x1xf32> -> vector<2x2x1xf32>
    %44 = vector.broadcast %43 : vector<2x2x1xf32> to vector<2x2x2xf32>
    %45 = arith.mulf %40, %44 : vector<2x2x2xf32>
    %46 = arith.truncf %45 : vector<2x2x2xf32> to vector<2x2x2xbf16>
    "tpu.trace_start"() <{level = 10 : i32, message = "hqk,hkd->hqd"}> : () -> ()
    %cst_14 = arith.constant dense<0.000000e+00> : vector<2x2x16xf32>
    %47 = tpu.matmul %46, %29, %cst_14 {dimension_numbers = #tpu.dot_dimension_numbers<[2], [1], [1], [2], [0, 0, 0, 1, 1, 2], [0], [0]>} : vector<2x2x2xbf16>, vector<2x2x16xbf16>, vector<2x2x16xf32> -> vector<2x2x16xf32>
    "tpu.trace_stop"() : () -> ()
    %48 = arith.truncf %47 : vector<2x2x16xf32> to vector<2x2x16xbf16>
    %c0_15 = arith.constant 0 : index
    %c0_16 = arith.constant 0 : index
    %c0_17 = arith.constant 0 : index
    %49 = vector.load %arg8[%c0_15, %c0_16, %c0_17] : memref<1x32x32xbf16, #tpu.memory_space<vmem>>, vector<1x32x32xbf16>
    %50 = vector.shape_cast %49 : vector<1x32x32xbf16> to vector<32x32xbf16>
    %51 = vector.extract_strided_slice %48 {offsets = [0, 0, 0], sizes = [1, 2, 16], strides = [1, 1, 1]} : vector<2x2x16xbf16> to vector<1x2x16xbf16>
    %52 = vector.shape_cast %51 : vector<1x2x16xbf16> to vector<2x16xbf16>
    %53 = vector.extract_strided_slice %50 {offsets = [0, 0], sizes = [16, 32], strides = [1, 1]} : vector<32x32xbf16> to vector<16x32xbf16>
    %cst_18 = arith.constant dense<0.000000e+00> : vector<2x32xf32>
    %54 = tpu.matmul %52, %53, %cst_18 {dimension_numbers = #tpu.dot_dimension_numbers<[1], [0], [0], [1], [0, 0, 1, 1], [], []>} : vector<2x16xbf16>, vector<16x32xbf16>, vector<2x32xf32> -> vector<2x32xf32>
    %55 = vector.extract_strided_slice %48 {offsets = [1, 0, 0], sizes = [1, 2, 16], strides = [1, 1, 1]} : vector<2x2x16xbf16> to vector<1x2x16xbf16>
    %56 = vector.shape_cast %55 : vector<1x2x16xbf16> to vector<2x16xbf16>
    %57 = vector.extract_strided_slice %50 {offsets = [16, 0], sizes = [16, 32], strides = [1, 1]} : vector<32x32xbf16> to vector<16x32xbf16>
    %cst_19 = arith.constant dense<0.000000e+00> : vector<2x32xf32>
    %58 = tpu.matmul %56, %57, %cst_19 {dimension_numbers = #tpu.dot_dimension_numbers<[1], [0], [0], [1], [0, 0, 1, 1], [], []>} : vector<2x16xbf16>, vector<16x32xbf16>, vector<2x32xf32> -> vector<2x32xf32>
    %59 = arith.addf %54, %58 : vector<2x32xf32>
    %c0_20 = arith.constant 0 : index
    %c0_21 = arith.constant 0 : index
    %c0_22 = arith.constant 0 : index
    %60 = vector.load %arg9[%c0_20, %c0_21, %c0_22] : memref<1x1x32xf32, #tpu.memory_space<vmem>>, vector<1x1x32xf32>
    %61 = vector.shape_cast %60 : vector<1x1x32xf32> to vector<1x32xf32>
    %62 = vector.broadcast %61 : vector<1x32xf32> to vector<2x32xf32>
    %63 = arith.addf %59, %62 : vector<2x32xf32>
    %64 = arith.addf %63, %5 : vector<2x32xf32>
    %c0_23 = arith.constant 0 : index
    %c0_24 = arith.constant 0 : index
    %c0_25 = arith.constant 0 : index
    %65 = vector.load %arg10[%c0_23, %c0_24, %c0_25] : memref<1x1x32xf32, #tpu.memory_space<vmem>>, vector<1x1x32xf32>
    %66 = vector.shape_cast %65 : vector<1x1x32xf32> to vector<1x32xf32>
    %c0_26 = arith.constant 0 : index
    %c0_27 = arith.constant 0 : index
    %c0_28 = arith.constant 0 : index
    %67 = vector.load %arg11[%c0_26, %c0_27, %c0_28] : memref<1x1x32xf32, #tpu.memory_space<vmem>>, vector<1x1x32xf32>
    %68 = vector.shape_cast %67 : vector<1x1x32xf32> to vector<1x32xf32>
    %cst_29 = arith.constant dense<0.000000e+00> : vector<2xf32>
    %69 = vector.multi_reduction <add>, %64, %cst_29 [1] : vector<2x32xf32> to vector<2xf32>
    %70 = vector.shape_cast %69 : vector<2xf32> to vector<2x1xf32>
    %cst_30 = arith.constant 3.200000e+01 : f32
    %71 = vector.broadcast %cst_30 : f32 to vector<2x1xf32>
    %72 = arith.divf %70, %71 : vector<2x1xf32>
    %73 = vector.broadcast %72 : vector<2x1xf32> to vector<2x32xf32>
    %74 = arith.subf %64, %73 : vector<2x32xf32>
    %75 = arith.mulf %74, %74 : vector<2x32xf32>
    %cst_31 = arith.constant dense<0.000000e+00> : vector<2xf32>
    %76 = vector.multi_reduction <add>, %75, %cst_31 [1] : vector<2x32xf32> to vector<2xf32>
    %77 = vector.shape_cast %76 : vector<2xf32> to vector<2x1xf32>
    %cst_32 = arith.constant 3.200000e+01 : f32
    %78 = vector.broadcast %cst_32 : f32 to vector<2x1xf32>
    %79 = arith.divf %77, %78 : vector<2x1xf32>
    %cst_33 = arith.constant 9.99999996E-13 : f32
    %80 = vector.broadcast %cst_33 : f32 to vector<2x1xf32>
    %81 = arith.addf %79, %80 : vector<2x1xf32>
    %82 = math.rsqrt %81 : vector<2x1xf32>
    %83 = vector.broadcast %82 : vector<2x1xf32> to vector<2x32xf32>
    %84 = arith.mulf %74, %83 : vector<2x32xf32>
    %85 = vector.broadcast %66 : vector<1x32xf32> to vector<2x32xf32>
    %86 = arith.mulf %84, %85 : vector<2x32xf32>
    %87 = vector.broadcast %68 : vector<1x32xf32> to vector<2x32xf32>
    %88 = arith.addf %86, %87 : vector<2x32xf32>
    %89 = arith.truncf %88 : vector<2x32xf32> to vector<2x32xbf16>
    %c0_34 = arith.constant 0 : index
    %c0_35 = arith.constant 0 : index
    %c0_36 = arith.constant 0 : index
    %90 = vector.load %arg12[%c0_34, %c0_35, %c0_36] : memref<1x32x64xbf16, #tpu.memory_space<vmem>>, vector<1x32x64xbf16>
    %91 = vector.shape_cast %90 : vector<1x32x64xbf16> to vector<32x64xbf16>
    %cst_37 = arith.constant dense<0.000000e+00> : vector<2x64xf32>
    %92 = tpu.matmul %89, %91, %cst_37 {dimension_numbers = #tpu.dot_dimension_numbers<[1], [0], [0], [1], [0, 0, 1, 1], [], []>} : vector<2x32xbf16>, vector<32x64xbf16>, vector<2x64xf32> -> vector<2x64xf32>
    %c0_38 = arith.constant 0 : index
    %c0_39 = arith.constant 0 : index
    %c0_40 = arith.constant 0 : index
    %93 = vector.load %arg13[%c0_38, %c0_39, %c0_40] : memref<1x1x64xf32, #tpu.memory_space<vmem>>, vector<1x1x64xf32>
    %94 = vector.shape_cast %93 : vector<1x1x64xf32> to vector<1x64xf32>
    %95 = vector.broadcast %94 : vector<1x64xf32> to vector<2x64xf32>
    %96 = arith.addf %92, %95 : vector<2x64xf32>
    %cst_41 = arith.constant 5.000000e-01 : f32
    %97 = vector.broadcast %cst_41 : f32 to vector<2x64xf32>
    %98 = arith.mulf %97, %96 : vector<2x64xf32>
    %cst_42 = arith.constant 0.707106769 : f32
    %99 = vector.broadcast %cst_42 : f32 to vector<2x64xf32>
    %100 = arith.mulf %96, %99 : vector<2x64xf32>
    %cst_43 = arith.constant 0.000000e+00 : f32
    %101 = vector.broadcast %cst_43 : f32 to vector<2x64xf32>
    %102 = arith.cmpf oge, %100, %101 : vector<2x64xf32>
    %cst_44 = arith.constant 1.000000e+00 : f32
    %cst_45 = arith.constant -1.000000e+00 : f32
    %103 = vector.broadcast %cst_44 : f32 to vector<2x64xf32>
    %104 = vector.broadcast %cst_45 : f32 to vector<2x64xf32>
    %105 = arith.select %102, %103, %104 : vector<2x64xi1>, vector<2x64xf32>
    %106 = math.absf %100 : vector<2x64xf32>
    %cst_46 = arith.constant 0.327591091 : f32
    %107 = vector.broadcast %cst_46 : f32 to vector<2x64xf32>
    %108 = arith.mulf %107, %106 : vector<2x64xf32>
    %cst_47 = arith.constant 1.000000e+00 : f32
    %109 = vector.broadcast %cst_47 : f32 to vector<2x64xf32>
    %110 = arith.addf %109, %108 : vector<2x64xf32>
    %111 = tpu.reciprocal %110 : vector<2x64xf32> -> vector<2x64xf32>
    %cst_48 = arith.constant 1.06140542 : f32
    %112 = vector.broadcast %cst_48 : f32 to vector<2x64xf32>
    %113 = arith.mulf %112, %111 : vector<2x64xf32>
    %cst_49 = arith.constant -1.45315206 : f32
    %114 = vector.broadcast %cst_49 : f32 to vector<2x64xf32>
    %115 = arith.addf %113, %114 : vector<2x64xf32>
    %116 = arith.mulf %115, %111 : vector<2x64xf32>
    %cst_50 = arith.constant 1.42141378 : f32
    %117 = vector.broadcast %cst_50 : f32 to vector<2x64xf32>
    %118 = arith.addf %116, %117 : vector<2x64xf32>
    %119 = arith.mulf %118, %111 : vector<2x64xf32>
    %cst_51 = arith.constant -0.284496725 : f32
    %120 = vector.broadcast %cst_51 : f32 to vector<2x64xf32>
    %121 = arith.addf %119, %120 : vector<2x64xf32>
    %122 = arith.mulf %121, %111 : vector<2x64xf32>
    %cst_52 = arith.constant 0.254829586 : f32
    %123 = vector.broadcast %cst_52 : f32 to vector<2x64xf32>
    %124 = arith.addf %122, %123 : vector<2x64xf32>
    %125 = arith.mulf %124, %111 : vector<2x64xf32>
    %cst_53 = arith.constant 0.000000e+00 : f32
    %126 = vector.broadcast %cst_53 : f32 to vector<2x64xf32>
    %127 = arith.subf %126, %106 : vector<2x64xf32>
    %128 = arith.mulf %127, %106 : vector<2x64xf32>
    %129 = math.exp %128 : vector<2x64xf32>
    %130 = arith.mulf %125, %129 : vector<2x64xf32>
    %cst_54 = arith.constant 1.000000e+00 : f32
    %131 = vector.broadcast %cst_54 : f32 to vector<2x64xf32>
    %132 = arith.subf %131, %130 : vector<2x64xf32>
    %133 = arith.mulf %105, %132 : vector<2x64xf32>
    %cst_55 = arith.constant 1.000000e+00 : f32
    %134 = vector.broadcast %cst_55 : f32 to vector<2x64xf32>
    %135 = arith.addf %134, %133 : vector<2x64xf32>
    %136 = arith.mulf %98, %135 : vector<2x64xf32>
    %137 = arith.truncf %136 : vector<2x64xf32> to vector<2x64xbf16>
    %c0_56 = arith.constant 0 : index
    %c0_57 = arith.constant 0 : index
    %c0_58 = arith.constant 0 : index
    %138 = vector.load %arg14[%c0_56, %c0_57, %c0_58] : memref<1x64x32xbf16, #tpu.memory_space<vmem>>, vector<1x64x32xbf16>
    %139 = vector.shape_cast %138 : vector<1x64x32xbf16> to vector<64x32xbf16>
    %cst_59 = arith.constant dense<0.000000e+00> : vector<2x32xf32>
    %140 = tpu.matmul %137, %139, %cst_59 {dimension_numbers = #tpu.dot_dimension_numbers<[1], [0], [0], [1], [0, 0, 1, 1], [], []>} : vector<2x64xbf16>, vector<64x32xbf16>, vector<2x32xf32> -> vector<2x32xf32>
    %c0_60 = arith.constant 0 : index
    %c0_61 = arith.constant 0 : index
    %c0_62 = arith.constant 0 : index
    %141 = vector.load %arg15[%c0_60, %c0_61, %c0_62] : memref<1x1x32xf32, #tpu.memory_space<vmem>>, vector<1x1x32xf32>
    %142 = vector.shape_cast %141 : vector<1x1x32xf32> to vector<1x32xf32>
    %143 = vector.broadcast %142 : vector<1x32xf32> to vector<2x32xf32>
    %144 = arith.addf %140, %143 : vector<2x32xf32>
    %145 = arith.addf %144, %88 : vector<2x32xf32>
    %c0_63 = arith.constant 0 : index
    %c0_64 = arith.constant 0 : index
    %c0_65 = arith.constant 0 : index
    %146 = vector.load %arg16[%c0_63, %c0_64, %c0_65] : memref<1x1x32xf32, #tpu.memory_space<vmem>>, vector<1x1x32xf32>
    %147 = vector.shape_cast %146 : vector<1x1x32xf32> to vector<1x32xf32>
    %c0_66 = arith.constant 0 : index
    %c0_67 = arith.constant 0 : index
    %c0_68 = arith.constant 0 : index
    %148 = vector.load %arg17[%c0_66, %c0_67, %c0_68] : memref<1x1x32xf32, #tpu.memory_space<vmem>>, vector<1x1x32xf32>
    %149 = vector.shape_cast %148 : vector<1x1x32xf32> to vector<1x32xf32>
    %cst_69 = arith.constant dense<0.000000e+00> : vector<2xf32>
    %150 = vector.multi_reduction <add>, %145, %cst_69 [1] : vector<2x32xf32> to vector<2xf32>
    %151 = vector.shape_cast %150 : vector<2xf32> to vector<2x1xf32>
    %cst_70 = arith.constant 3.200000e+01 : f32
    %152 = vector.broadcast %cst_70 : f32 to vector<2x1xf32>
    %153 = arith.divf %151, %152 : vector<2x1xf32>
    %154 = vector.broadcast %153 : vector<2x1xf32> to vector<2x32xf32>
    %155 = arith.subf %145, %154 : vector<2x32xf32>
    %156 = arith.mulf %155, %155 : vector<2x32xf32>
    %cst_71 = arith.constant dense<0.000000e+00> : vector<2xf32>
    %157 = vector.multi_reduction <add>, %156, %cst_71 [1] : vector<2x32xf32> to vector<2xf32>
    %158 = vector.shape_cast %157 : vector<2xf32> to vector<2x1xf32>
    %cst_72 = arith.constant 3.200000e+01 : f32
    %159 = vector.broadcast %cst_72 : f32 to vector<2x1xf32>
    %160 = arith.divf %158, %159 : vector<2x1xf32>
    %cst_73 = arith.constant 9.99999996E-13 : f32
    %161 = vector.broadcast %cst_73 : f32 to vector<2x1xf32>
    %162 = arith.addf %160, %161 : vector<2x1xf32>
    %163 = math.rsqrt %162 : vector<2x1xf32>
    %164 = vector.broadcast %163 : vector<2x1xf32> to vector<2x32xf32>
    %165 = arith.mulf %155, %164 : vector<2x32xf32>
    %166 = vector.broadcast %147 : vector<1x32xf32> to vector<2x32xf32>
    %167 = arith.mulf %165, %166 : vector<2x32xf32>
    %168 = vector.broadcast %149 : vector<1x32xf32> to vector<2x32xf32>
    %169 = arith.addf %167, %168 : vector<2x32xf32>
    %170 = arith.index_cast %arg1 : i32 to index
    %c0_74 = arith.constant 0 : index
    %c0_75 = arith.constant 0 : index
    %171 = vector.load %arg19[%170, %c0_74, %c0_75] : memref<1x2x32xf32, #tpu.memory_space<vmem>>, vector<1x2x32xf32>
    %172 = vector.shape_cast %171 : vector<1x2x32xf32> to vector<2x32xf32>
    %173 = vector.shape_cast %169 : vector<2x32xf32> to vector<1x2x32xf32>
    tpu.vector_store %arg19[%170, %c0_74, %c0_75], %173 {strides = array<i32>} : memref<1x2x32xf32, #tpu.memory_space<vmem>>, vector<1x2x32xf32>,
    %c0_76 = arith.constant 0 : index
    %c0_77 = arith.constant 0 : index
    %c0_78 = arith.constant 0 : index
    %174 = vector.load %arg18[%c0_76, %c0_77, %c0_78] : memref<1x2x32xf32, #tpu.memory_space<vmem>>, vector<1x2x32xf32>
    %175 = vector.shape_cast %174 : vector<1x2x32xf32> to vector<2x32xf32>
    %176 = vector.shape_cast %169 : vector<2x32xf32> to vector<1x2x32xf32>
    tpu.vector_store %arg18[%c0_76, %c0_77, %c0_78], %176 {strides = array<i32>} : memref<1x2x32xf32, #tpu.memory_space<vmem>>, vector<1x2x32xf32>,
    return
  }
  func.func @transform_0(%arg0: i32, %arg1: i32) -> (i32, i32, i32) {
    %c0_i32 = arith.constant 0 : i32
    %c0_i32_0 = arith.constant 0 : i32
    %c0_i32_1 = arith.constant 0 : i32
    return %arg1, %c0_i32, %c0_i32_0 : i32, i32, i32
  }
  func.func @transform_1(%arg0: i32, %arg1: i32) -> (i32, i32, i32) {
    %c0_i32 = arith.constant 0 : i32
    %c0_i32_0 = arith.constant 0 : i32
    %c0_i32_1 = arith.constant 0 : i32
    return %arg1, %c0_i32, %c0_i32_0 : i32, i32, i32
  }
  func.func @transform_2(%arg0: i32, %arg1: i32) -> (i32, i32) {
    %c0_i32 = arith.constant 0 : i32
    %c0_i32_0 = arith.constant 0 : i32
    %c0_i32_1 = arith.constant 0 : i32
    return %c0_i32, %c0_i32_0 : i32, i32
  }
  func.func @transform_3(%arg0: i32, %arg1: i32) -> (i32, i32) {
    %c0_i32 = arith.constant 0 : i32
    %c0_i32_0 = arith.constant 0 : i32
    %c0_i32_1 = arith.constant 0 : i32
    return %c0_i32, %c0_i32_0 : i32, i32
  }
  func.func @transform_4(%arg0: i32, %arg1: i32) -> (i32, i32, i32) {
    %c0_i32 = arith.constant 0 : i32
    %c0_i32_0 = arith.constant 0 : i32
    %c0_i32_1 = arith.constant 0 : i32
    return %arg0, %c0_i32, %c0_i32_0 : i32, i32, i32
  }
  func.func @transform_5(%arg0: i32, %arg1: i32) -> (i32, i32, i32) {
    %c0_i32 = arith.constant 0 : i32
    %c0_i32_0 = arith.constant 0 : i32
    %c0_i32_1 = arith.constant 0 : i32
    return %arg0, %c0_i32, %c0_i32_0 : i32, i32, i32
  }
  func.func @transform_6(%arg0: i32, %arg1: i32) -> (i32, i32, i32) {
    %c0_i32 = arith.constant 0 : i32
    %c0_i32_0 = arith.constant 0 : i32
    %c0_i32_1 = arith.constant 0 : i32
    return %arg0, %c0_i32, %c0_i32_0 : i32, i32, i32
  }
  func.func @transform_7(%arg0: i32, %arg1: i32) -> (i32, i32, i32) {
    %c0_i32 = arith.constant 0 : i32
    %c0_i32_0 = arith.constant 0 : i32
    %c0_i32_1 = arith.constant 0 : i32
    return %arg0, %c0_i32, %c0_i32_0 : i32, i32, i32
  }
  func.func @transform_8(%arg0: i32, %arg1: i32) -> (i32, i32, i32) {
    %c0_i32 = arith.constant 0 : i32
    %c0_i32_0 = arith.constant 0 : i32
    %c0_i32_1 = arith.constant 0 : i32
    return %arg0, %c0_i32, %c0_i32_0 : i32, i32, i32
  }
  func.func @transform_9(%arg0: i32, %arg1: i32) -> (i32, i32, i32) {
    %c0_i32 = arith.constant 0 : i32
    %c0_i32_0 = arith.constant 0 : i32
    %c0_i32_1 = arith.constant 0 : i32
    return %arg0, %c0_i32, %c0_i32_0 : i32, i32, i32
  }
  func.func @transform_10(%arg0: i32, %arg1: i32) -> (i32, i32, i32) {
    %c0_i32 = arith.constant 0 : i32
    %c0_i32_0 = arith.constant 0 : i32
    %c0_i32_1 = arith.constant 0 : i32
    return %arg0, %c0_i32, %c0_i32_0 : i32, i32, i32
  }
  func.func @transform_11(%arg0: i32, %arg1: i32) -> (i32, i32, i32) {
    %c0_i32 = arith.constant 0 : i32
    %c0_i32_0 = arith.constant 0 : i32
    %c0_i32_1 = arith.constant 0 : i32
    return %arg0, %c0_i32, %c0_i32_0 : i32, i32, i32
  }
  func.func @transform_12(%arg0: i32, %arg1: i32) -> (i32, i32, i32) {
    %c0_i32 = arith.constant 0 : i32
    %c0_i32_0 = arith.constant 0 : i32
    %c0_i32_1 = arith.constant 0 : i32
    return %arg0, %c0_i32, %c0_i32_0 : i32, i32, i32
  }
  func.func @transform_13(%arg0: i32, %arg1: i32) -> (i32, i32, i32) {
    %c0_i32 = arith.constant 0 : i32
    %c0_i32_0 = arith.constant 0 : i32
    %c0_i32_1 = arith.constant 0 : i32
    return %arg0, %c0_i32, %c0_i32_0 : i32, i32, i32
  }
  func.func @transform_14(%arg0: i32, %arg1: i32) -> (i32, i32, i32) {
    %c0_i32 = arith.constant 0 : i32
    %c0_i32_0 = arith.constant 0 : i32
    %c0_i32_1 = arith.constant 0 : i32
    return %arg0, %c0_i32, %c0_i32_0 : i32, i32, i32
  }
  func.func @transform_15(%arg0: i32, %arg1: i32) -> (i32, i32, i32) {
    %c0_i32 = arith.constant 0 : i32
    %c0_i32_0 = arith.constant 0 : i32
    %c0_i32_1 = arith.constant 0 : i32
    return %arg0, %c0_i32, %c0_i32_0 : i32, i32, i32
  }
  func.func @transform_16(%arg0: i32, %arg1: i32) -> (i32, i32, i32) {
    %c0_i32 = arith.constant 0 : i32
    %c0_i32_0 = arith.constant 0 : i32
    %c0_i32_1 = arith.constant 0 : i32
    return %arg1, %c0_i32, %c0_i32_0 : i32, i32, i32
  }
}

</mosaic_0001>

<bundles_post_ra>
// kernel: cobert_forward.3
= control target key start
LH: loop header
LB: loop body
LE: loop exit
PB: predicated region body
PF: predicated region fallthrough
CT: control target
= control target key end

     0   :  { %s1940_s21 = smov 0   ;;  %s1942_s22 = smov 0   ;;  %s2150_s0 = inlined_call_operand.vmem [shape: f32[1,2,32], index: 0, kind: input, shape index: {}]   ;;  %s2151_s1 = inlined_call_operand.vmem [shape: f32[1,1,2], index: 1, kind: input, shape index: {}]   ;;  %s2152_s2 = inlined_call_operand.vmem [shape: f32[1,32], index: 2, kind: input, shape index: {}]   ;;  %s2153_s3 = inlined_call_operand.vmem [shape: f32[1,32], index: 3, kind: input, shape index: {}]   ;;  %s2154_s4 = inlined_call_operand.vmem [shape: bf16[2,32,96], index: 4, kind: input, shape index: {}]   ;;  %s2155_s5 = inlined_call_operand.vmem [shape: f32[2,1,96], index: 5, kind: input, shape index: {}]   ;;  %s2156_s6 = inlined_call_operand.vmem [shape: bf16[2,32,32], index: 6, kind: input, shape index: {}]   ;;  %s2157_s7 = inlined_call_operand.vmem [shape: f32[2,1,32], index: 7, kind: input, shape index: {}, may-alias: {7,9,13,15}]   ;;  %s2158_s8 = inlined_call_operand.vmem [shape: f32[2,1,32], index: 8, kind: input, shape index: {}, may-alias: {8,14}]   ;;  %s2159_s9 = inlined_call_operand.vmem [shape: f32[2,1,32], index: 9, kind: input, shape index: {}, may-alias: {7,9,13,15}]   ;;  %s2160_s10 = inlined_call_operand.vmem [shape: bf16[2,32,64], index: 10, kind: input, shape index: {}]   ;;  %s2161_s11 = inlined_call_operand.vmem [shape: f32[2,1,64], index: 11, kind: input, shape index: {}]   ;;  %s2162_s12 = inlined_call_operand.vmem [shape: bf16[2,64,32], index: 12, kind: input, shape index: {}]   ;;  %s2163_s13 = inlined_call_operand.vmem [shape: f32[2,1,32], index: 13, kind: input, shape index: {}, may-alias: {7,9,13,15}]   ;;  %s2164_s14 = inlined_call_operand.vmem [shape: f32[2,1,32], index: 14, kind: input, shape index: {}, may-alias: {8,14}]   ;;  %s2165_s15 = inlined_call_operand.vmem [shape: f32[2,1,32], index: 15, kind: input, shape index: {}, may-alias: {7,9,13,15}]   ;;  %s2166_s16 = inlined_call_operand.vmem [shape: f32[1,2,32], index: 16, kind: output, shape index: {}]  }
   0x1   :  { %2170 = sst [smem:[#allocation7_spill]] %s2150_s0  ;;  %s1944_s23 = smov 0  }
   0x2   :  { %2171 = sst [smem:[#allocation8_spill]] %s2151_s1 }
   0x3   :  { %2172 = sst [smem:[#allocation9_spill]] %s2153_s3 }
   0x4   :  { %2173 = sst [smem:[#allocation10_spill]] %s2154_s4 }
   0x5   :  { %2174 = sst [smem:[#allocation11_spill]] %s2156_s6 }
   0x6   :  { %2175 = sst [smem:[#allocation12_spill]] %s2166_s16 }
   0x7 LB: > { %2176 = sst [smem:[#allocation3_spill]] %s1843_s22  ;;  %s38_s24 = sadd.s32 1, %s1843_s22  ;;  %s1847_s23 = sphi %s1944_s23, %s26_s23   ;;  %s1843_s22 = sphi %s1942_s22, %s2194_s22   ;;  %s1839_s21 = sphi %s1940_s21, %s2193_s21  }
   0x8   : > { %2177 = sst [smem:[#allocation4_spill]] %s1847_s23  ;;  %p1633_p0 = scmp.ge.s32.totalorder %s1847_s23, 1 }
   0x9   : > { %p40_p1 = scmp.ge.s32.totalorder %s38_s24, 2  ;;  %p585_p2 = scmp.lt.s32.totalorder %s1847_s23, 3 }
   0xb   : > { %s2196_s24 = smov (%p40_p1, %s38_s24), 0  ;;  %p586_p3 = pnand %p1633_p0, %p585_p2 }
   0xc   : > { %2178 = sst [smem:[#allocation5_spill]] %s2196_s24 }
   0xd   : > { %589 = sbr.rel (%p586_p3) target bundleno = 2881 (0xb41), region = 84 }
  0x14   : > { %p687_p4 = scmp.lt.s32.totalorder %s1839_s21, 1  ;;  %s2179_s4 = sld [smem:[#allocation10_spill]] }
  0x15   : > { %s2180_s6 = sld [smem:[#allocation11_spill]]  ;;  %p1642_p5 = scmp.ne.s32.totalorder %s1839_s21, 0 }
  0x16   : > { %s1958_s25 = scalar_select %p687_p4, %s1839_s21, 1 }
  0x17   : > { %739 = sbr.rel (%p1642_p5) target bundleno = 348 (0x15c), region = 88  ;;  %vm743_vm0 = vcmask (!%p1642_p5), 254976   ;;  %v1643_v11 = vld [vmem:[%s2152_s2] ss:$0 sm:$0xff] (!%p1642_p5)  ;;  %s2183_s22 = sld [smem:[#allocation9_spill]] (!%p1642_p5) }
  0x18   : > { %s1676_s26 = sshll.u32 %s1958_s25, 4  ;;  %s724_s27 = scalar_lea.vmem %s2163_s13, %s1958_s25 }
  0x19   : > { %s727_s30 = scalar_lea.vmem %s2164_s14, %s1958_s25  ;;  %s730_s3 = scalar_lea.vmem %s2165_s15, %s1958_s25 }
  0x1a   : > { %s1968_s17 = scalar_lea.vmem %s2179_s4, %s1676_s26  ;;  %s1990_s4 = scalar_lea.vmem %s2160_s10, %s1676_s26 }
  0x1b   : > { %s1973_s20 = scalar_lea.vmem %s2180_s6, %s1676_s26  ;;  %s2182_s6 = sld [smem:[#allocation7_spill]] (!%p1642_p5) }
  0x1c   : > { %2181 = sst [smem:[#allocation6_spill]] %s1973_s20  ;;  %s1679_s20 = sshll.u32 %s1958_s25, 5 }
  0x1d   : > { %s2000_s23 = scalar_lea.vmem %s2162_s12, %s1679_s20  ;;  %v1644_v13 = vld [vmem:[%s2183_s22] ss:$0 sm:$0xff] (!%p1642_p5) }
  0x21   : > { %v740_v0 = vld [vmem:[%s2182_s6] sm:$0x3] }
  0x22   : > { %v744_v1 = vsel %vm743_vm0, %v740_v0, 0.0 }
  0x23   : > { %745 = vadd.xlane.f32.xlu0 %v744_v1 }
  0xb0   : > { %v746_v2 = vpop.xlane.xlu0 %745 }
  0xb1   : > { %v748_v3 = vmul.f32 0.03125, %v746_v2 }
  0xb3   : > { %v749_v4 = vsub.f32 %v740_v0, %v748_v3 }
  0xb5   : > { %v750_v5 = vmul.f32 %v749_v4, %v749_v4 }
  0xb7   : > { %v751_v6 = vsel %vm743_vm0, %v750_v5, 0.0 }
  0xb8   : > { %752 = vadd.xlane.f32.xlu0 %v751_v6 }
 0x145   : > { %v753_v7 = vpop.xlane.xlu0 %752 }
 0x146   : > { %v754_v8 = vmul.f32 0.03125, %v753_v7 }
 0x148   : > { %v755_v9 = vadd.f32 1e-12, %v754_v8 }
 0x14a   : > { %1797 = vrsqrt.f32 %v755_v9 }
 0x154   : > { %v1798_v10 = vpop.eup %1797 }
 0x155   : > { %v757_v12 = vmul.f32 %v1798_v10, %v749_v4 }
 0x157   : > { %v764_v14 = vmul.f32 %v1643_v11, %v757_v12 }
 0x159   : > { %v771_v15 = vadd.f32 %v1644_v13, %v764_v14 }
 0x15b   : > { %774 = vst.msk [vmem:[#allocation2] sm:$0x3] %vm743_vm0, %v771_v15 }
 0x15c PF: > { %v1799_v16 = vld [vmem:[%s1968_s17] sm:$0xff]   ;;  %v1849_v17 = vmov 0.0   ;;  %v1800_v18 = vld [vmem:[%s1968_s17 + $0x8] sm:$0xff]   ;;  %vm1850_vm1 = vmmov 0   ;;  %vm802_vm2 = vcmask 261120   ;;  %s2184_s1 = scalar_lea.vmem %s2155_s5, %s1958_s25  ;;  %s1851_s16 = smov 112  }
 0x15d   : > { %1703 = vmatprep.subr.bf16.mxu1 %v1849_v17  ;;  %1717 = vmatprep.subr.bf16.mxu0 %v1849_v17  ;;  %v1645_v21 = vld [vmem:[%s2184_s1] ss:$0 sm:$0xff]  ;;  %s1852_s28 = smov 96   ;;  %vm859_vm3 = vcmask 130048   ;;  %s2185_s18 = sld [smem:[#allocation8_spill]]  ;;  %vm954_vm4 = vcmask 9216  }
 0x15e   : > { %1704 = vmatpush3.bf16.msra.mxu1 %v1799_v16  ;;  %1707 = vmatprep.mubr.msk.bf16.mxu1 %vm1850_vm1, %v1849_v17  ;;  %s1853_s19 = smov 64   ;;  %s2186_s21 = sld [smem:[#allocation6_spill]]  ;;  %vm985_vm5 = vcmask 1040384   ;;  %vm981_vm6 = vcmask 15360   ;;  %vm1192_vm7 = vcmask 254976   ;;  %vm1354_vm9 = vcmask 523264  }
 0x15f   : > { %1705 = vmatprep.subr.bf16.mxu1 %v1849_v17  ;;  %1719 = vmatprep.mubr.msk.bf16.mxu0 %vm1850_vm1, %v1849_v17  ;;  %s2187_s20 = scalar_lea.vmem %s2157_s7, %s1958_s25  ;;  %s2188_s24 = scalar_lea.vmem %s2158_s8, %s1958_s25 }
 0x160   : > { %s2190_s0 = scalar_lea.vmem %s2161_s11, %s1958_s25  ;;  %s2191_s22 = sld [smem:[#allocation12_spill]] }
 0x162   : > { %v2032_v19 = vld [vmem:[#allocation2] sm:$0x3]  ;;  %1706 = vmatpush3.bf16.msra.mxu1 %v1800_v18 }
 0x163   : > { %v778_v20 = vpack.c.bf16 %v2032_v19, %v2032_v19  ;;  %1711 = vmatprep.subr.bf16.mxu1 %v1849_v17  ;;  %v1649_v33 = vld [vmem:[%s2185_s18] ss:$0 sm:$0xff] }
 0x164   : > { %v1802_v62 = vld [vmem:[%s2186_s21 + $0x8] sm:$0xff]   ;;  %v1801_v4 = vld [vmem:[%s2186_s21] sm:$0xff]  }
 0x165   : > { %1708 = vmatmul.mubr.msk.bf16.vlgmr.msra.gmra.mrb[0].mxu1 %vm802_vm2, %v778_v20 }
 0x166   : > { %1713 = vmatprep.mubr.msk.bf16.mxu1 %vm1850_vm1, %v1849_v17 }
 0x238   : > { %v840_v22 = vpop.f32.mrb[0].mxu1 }
 0x239   : > { %v841_v23 = vadd.f32 %v1645_v21, %v840_v22  ;;  %v1709_v24 = vpop.f32.mrb[1].mxu1 }
 0x23a   : > { %v843_v25 = vpop.f32.mrb[2].mxu1 }
 0x23b   : > { %v846_v26 = vpack.c.bf16 %v841_v23, %v841_v23  ;;  %v1710_v27 = vpop.f32.mrb[3].mxu1  ;;  %v1658_v23 = vld [vmem:[%s2187_s20] ss:$0 sm:$0xff] }
 0x23d   : > { %848 = vrot.lane.b32.xlu0 %v846_v26, %s1851_s16 }
 0x241   : > { %857 = vrot.lane.b32.xlu0 %v846_v26, %s1852_s28 }
 0x2af   : > { %v849_v28 = vpop.permute.xlu0 %848 }
 0x2b0   : > { %906 = vrot.lane.b32.xlu1 %v849_v28, %s1852_s28  ;;  %s2189_s28 = scalar_lea.vmem %s2159_s9, %s1958_s25 }
 0x2b3   : > { %v858_v29 = vpop.permute.xlu0 %857 }
 0x2b4   : > { %v864_v30 = vsel %vm859_vm3, %v858_v29, 0 }
 0x2b5   : > { %1712 = vmatpush3.bf16.xpose.msra.mxu1 %v864_v30 }
 0x2b6   : > { %1723 = vmatprep.subr.bf16.mxu1 %v1849_v17 }
 0x2bc   : > { %1714 = vmatmul.mubr.msk.bf16.vlgmr.msra.gmra.mrb[4].mxu1 %vm859_vm3, %v846_v26 }
 0x2bd   : > { %1725 = vmatprep.mubr.msk.bf16.mxu1 %vm1850_vm1, %v1849_v17 }
 0x322   : > { %v907_v31 = vpop.permute.xlu1 %906 }
 0x323   : > { %v912_v32 = vsel %vm859_vm3, %v907_v31, 0 }
 0x324   : > { %1718 = vmatpush3.bf16.xpose.msra.mxu0 %v912_v32 }
 0x325   : > { %1729 = vmatprep.subr.bf16.mxu0 %v1849_v17 }
 0x32b   : > { %1720 = vmatmul.mubr.msk.bf16.vlgmr.msra.gmra.mrb[0].mxu0 %vm859_vm3, %v849_v28 }
 0x32c   : > { %1731 = vmatprep.mubr.msk.bf16.mxu0 %vm1850_vm1, %v1849_v17 }
 0x38f   : > { %v900_v34 = vpop.f32.mrb[4].mxu1 }
 0x390   : > { %v901_v35 = vadd.f32 %v1649_v33, %v900_v34  ;;  %v1715_v36 = vpop.f32.mrb[5].mxu1 }
 0x391   : > { %v903_v37 = vpop.f32.mrb[6].mxu1  ;;  %v1803_v36 = vld [vmem:[%s1990_s4] sm:$0xff]  }
 0x392   : > { %v1716_v38 = vpop.f32.mrb[7].mxu1  ;;  %v955_v39 = vsel %vm954_vm4, %v901_v35, -inf  ;;  %v1804_v37 = vld [vmem:[%s1990_s4 + $0x8] sm:$0xff]  }
 0x393   : > { %956 = vmax.xlane.f32.xlu1 %v955_v39 }
 0x3fe   : > { %v948_v40 = vpop.f32.mrb[0].mxu0 }
 0x3ff   : > { %v949_v41 = vadd.f32 %v1649_v33, %v948_v40  ;;  %v1721_v42 = vpop.f32.mrb[1].mxu0 }
 0x400   : > { %v951_v43 = vpop.f32.mrb[2].mxu0 }
 0x401   : > { %v1722_v44 = vpop.f32.mrb[3].mxu0  ;;  %v958_v45 = vsel %vm954_vm4, %v949_v41, -inf  ;;  %v1660_v43 = vld [vmem:[%s2189_s28] ss:$0 sm:$0xff] }
 0x402   : > { %959 = vmax.xlane.f32.xlu0 %v958_v45 }
 0x420   : > { %v957_v46 = vpop.xlane.xlu1 %956 }
 0x421   : > { %v961_v47 = vsub.f32 %v901_v35, %v957_v46 }
 0x423   : > { %v963_v48 = vmul.f32 1.442695, %v961_v47  ;;  %v1805_v47 = vld [vmem:[%s2000_s23] sm:$0xff]  }
 0x425   : > { %1809 = vpow2.f32 %v963_v48  ;;  %v1806_v48 = vld [vmem:[%s2000_s23 + $0x8] sm:$0xff]  }
 0x42f   : > { %v1810_v49 = vpop.eup %1809 }
 0x430   : > { %v967_v50 = vsel %vm954_vm4, %v1810_v49, 0.0 }
 0x431   : > { %968 = vadd.xlane.f32.xlu0 %v967_v50  ;;  %v1808_v50 = vld [vmem:[%s2000_s23 + $0x18] sm:$0xff]  }
 0x447   : > { %979 = vrot.lane.b32.xlu0 %v846_v26, %s1853_s19 }
 0x48f   : > { %v960_v51 = vpop.xlane.xlu0 %959 }
 0x490   : > { %v962_v52 = vsub.f32 %v949_v41, %v960_v51  ;;  %v1659_v41 = vld [vmem:[%s2188_s24] ss:$0 sm:$0xff] }
 0x491   : > { %v1661_v51 = vld [vmem:[%s2190_s0] ss:$0 sm:$0xff] }
 0x492   : > { %v965_v53 = vmul.f32 1.442695, %v962_v52 }
 0x494   : > { %1811 = vpow2.f32 %v965_v53 }
 0x49e   : > { %v1812_v54 = vpop.eup %1811 }
 0x49f   : > { %v970_v55 = vsel %vm954_vm4, %v1812_v54, 0.0 }
 0x4a0   : > { %971 = vadd.xlane.f32.xlu1 %v970_v55 }
 0x4b1   : > { %1029 = vrot.lane.b32.xlu1 %v849_v28, %s1853_s19 }
 0x4be   : > { %v969_v56 = vpop.xlane.xlu0 %968 }
 0x4bf   : > { %1813 = vrcp.f32 %v969_v56 }
 0x4c2   : > { %v980_v57 = vpop.permute.xlu0 %979 }
 0x4c3   : > { %v987_v58 = vsel %vm985_vm5, %v980_v57, 0 }
 0x4c4   : > { %1724 = vmatpush3.bf16.msra.mxu1 %v987_v58 }
 0x4c5   : > { %1735 = vmatprep.subr.bf16.mxu1 %v1849_v17 }
 0x4c9   : > { %v1814_v59 = vpop.eup %1813 }
 0x4ca   : > { %v975_v60 = vmul.f32 %v1814_v59, %v1810_v49  ;;  %v1807_v49 = vld [vmem:[%s2000_s23 + $0x10] sm:$0xff]  }
 0x4cc   : > { %v977_v61 = vpack.c.bf16 %v975_v60, %v975_v60 }
 0x4ce   : > { %1726 = vmatmul.mubr.msk.bf16.vlgmr.msra.gmra.mrb[8].mxu1 %vm981_vm6, %v977_v61 }
 0x4cf   : > { %1737 = vmatprep.mubr.msk.bf16.mxu1 %vm1850_vm1, %v1849_v17  ;;  %1736 = vmatpush3.bf16.msra.mxu1 %v1802_v62 }
 0x4d0   : > { %1747 = vmatprep.subr.bf16.mxu1 %v1849_v17 }
 0x52d   : > { %v972_v63 = vpop.xlane.xlu1 %971 }
 0x52e   : > { %1815 = vrcp.f32 %v972_v63 }
 0x531   : > { %v1030_v0 = vpop.permute.xlu1 %1029 }
 0x532   : > { %v1035_v1 = vsel %vm985_vm5, %v1030_v0, 0 }
 0x533   : > { %1730 = vmatpush3.bf16.msra.mxu0 %v1035_v1 }
 0x534   : > { %1741 = vmatprep.subr.bf16.mxu0 %v1849_v17 }
 0x538   : > { %v1816_v2 = vpop.eup %1815 }
 0x539   : > { %v976_v3 = vmul.f32 %v1816_v2, %v1812_v54 }
 0x53b   : > { %v978_v5 = vpack.c.bf16 %v976_v3, %v976_v3 }
 0x53d   : > { %1732 = vmatmul.mubr.msk.bf16.vlgmr.msra.gmra.mrb[4].mxu0 %vm981_vm6, %v978_v5 }
 0x53e   : > { %1742 = vmatpush3.bf16.msra.mxu0 %v1801_v4  ;;  %1743 = vmatprep.mubr.msk.bf16.mxu0 %vm1850_vm1, %v1849_v17 }
 0x53f   : > { %1755 = vmatprep.subr.bf16.mxu0 %v1849_v17 }
 0x5a1   : > { %v1023_v6 = vpop.f32.mrb[8].mxu1 }
 0x5a2   : > { %v1077_v7 = vpack.c.bf16 %v1023_v6, %v1023_v6  ;;  %v1727_v8 = vpop.f32.mrb[9].mxu1 }
 0x5a3   : > { %v1026_v9 = vpop.f32.mrb[10].mxu1 }
 0x5a4   : > { %v1728_v10 = vpop.f32.mrb[11].mxu1  ;;  %1744 = vmatmul.mubr.msk.bf16.vlgmr.msra.gmra.mrb[8].mxu0 %vm859_vm3, %v1077_v7 }
 0x5a5   : > { %1763 = vmatprep.mubr.msk.bf16.mxu0 %vm1850_vm1, %v1849_v17  ;;  %1756 = vmatpush3.bf16.msra.mxu0 %v1805_v47 }
 0x5a6   : > { %1757 = vmatprep.subr.bf16.mxu0 %v1849_v17 }
 0x5a9   : > { %1758 = vmatpush3.bf16.msra.mxu0 %v1806_v48 }
 0x5aa   : > { %1759 = vmatprep.subr.bf16.mxu0 %v1849_v17 }
 0x5ad   : > { %1760 = vmatpush3.bf16.msra.mxu0 %v1807_v49 }
 0x5ae   : > { %1761 = vmatprep.subr.bf16.mxu0 %v1849_v17 }
 0x5b1   : > { %1762 = vmatpush3.bf16.msra.mxu0 %v1808_v50 }
 0x610   : > { %v1071_v11 = vpop.f32.mrb[4].mxu0 }
 0x611   : > { %v1078_v12 = vpack.c.bf16 %v1071_v11, %v1071_v11  ;;  %v1733_v13 = vpop.f32.mrb[5].mxu0 }
 0x612   : > { %v1074_v14 = vpop.f32.mrb[6].mxu0 }
 0x613   : > { %v1734_v15 = vpop.f32.mrb[7].mxu0  ;;  %1738 = vmatmul.mubr.msk.bf16.vlgmr.msra.gmra.mrb[12].mxu1 %vm859_vm3, %v1078_v12  ;;  %v1854_v12 = vmov -1.0  }
 0x614   : > { %1751 = vmatprep.mubr.msk.bf16.mxu1 %vm1850_vm1, %v1849_v17  ;;  %1748 = vmatpush3.bf16.msra.mxu1 %v1803_v36 }
 0x615   : > { %1749 = vmatprep.subr.bf16.mxu1 %v1849_v17 }
 0x618   : > { %1750 = vmatpush3.bf16.msra.mxu1 %v1804_v37 }
 0x677   : > { %v1175_v16 = vpop.f32.mrb[8].mxu0 }
 0x678   : > { %v1745_v18 = vpop.f32.mrb[9].mxu0 }
 0x679   : > { %v1178_v20 = vpop.f32.mrb[10].mxu0 }
 0x67a   : > { %v1746_v21 = vpop.f32.mrb[11].mxu0 }
 0x67b   : > { %v1665_v21 = vld [vmem:[%s724_s27] ss:$0 sm:$0xff] }
 0x6e6   : > { %v1126_v22 = vpop.f32.mrb[12].mxu1 }
 0x6e7   : > { %v1176_v24 = vadd.f32 %v1175_v16, %v1126_v22  ;;  %v1739_v25 = vpop.f32.mrb[13].mxu1 }
 0x6e8   : > { %v1129_v26 = vpop.f32.mrb[14].mxu1 }
 0x6e9   : > { %v1188_v27 = vadd.f32 %v1658_v23, %v1176_v24  ;;  %v1740_v28 = vpop.f32.mrb[15].mxu1 }
 0x6eb   : > { %v1189_v29 = vadd.f32 %v1188_v27, %v2032_v19 }
 0x6ed   : > { %v1193_v30 = vsel %vm1192_vm7, %v1189_v29, 0.0 }
 0x6ee   : > { %1194 = vadd.xlane.f32.xlu1 %v1193_v30 }
 0x77b   : > { %v1195_v31 = vpop.xlane.xlu1 %1194 }
 0x77c   : > { %v1197_v32 = vmul.f32 0.03125, %v1195_v31 }
 0x77e   : > { %v1198_v33 = vsub.f32 %v1189_v29, %v1197_v32 }
 0x780   : > { %v1199_v34 = vmul.f32 %v1198_v33, %v1198_v33 }
 0x782   : > { %v1200_v35 = vsel %vm1192_vm7, %v1199_v34, 0.0 }
 0x783   : > { %1201 = vadd.xlane.f32.xlu0 %v1200_v35 }
 0x810   : > { %v1202_v19 = vpop.xlane.xlu0 %1201 }
 0x811   : > { %v1203_v38 = vmul.f32 0.03125, %v1202_v19  ;;  %v1671_v19 = vld [vmem:[%s727_s30] ss:$0 sm:$0xff] }
 0x813   : > { %v1204_v39 = vadd.f32 1e-12, %v1203_v38 }
 0x815   : > { %1817 = vrsqrt.f32 %v1204_v39  ;;  %v1672_v39 = vld [vmem:[%s730_s3] ss:$0 sm:$0xff] }
 0x81f   : > { %v1818_v40 = vpop.eup %1817 }
 0x820   : > { %v1206_v42 = vmul.f32 %v1818_v40, %v1198_v33 }
 0x822   : > { %v1213_v44 = vmul.f32 %v1659_v41, %v1206_v42 }
 0x824   : > { %v1220_v45 = vadd.f32 %v1660_v43, %v1213_v44 }
 0x826   : > { %v1221_v46 = vpack.c.bf16 %v1220_v45, %v1220_v45 }
 0x828   : > { %1752 = vmatmul.mubr.msk.bf16.vlgmr.msra.gmra.mrb[16].mxu1 %vm802_vm2, %v1221_v46 }
 0x8fb   : > { %v1282_v52 = vpop.f32.mrb[16].mxu1 }
 0x8fc   : > { %v1283_v53 = vadd.f32 %v1661_v51, %v1282_v52  ;;  %v1753_v54 = vpop.f32.mrb[17].mxu1 }
 0x8fd   : > { %v1285_v55 = vpop.f32.mrb[18].mxu1 }
 0x8fe   : > { %v1289_v56 = vmul.f32 0.70710677, %v1283_v53  ;;  %v1754_v57 = vpop.f32.mrb[19].mxu1  ;;  %v1288_v15 = vmul.f32 0.5, %v1283_v53 }
 0x900   : > { %v1292_v58 = vand.u32 2147483647, %v1289_v56  ;;  %vm1290_vm8 = vcmp.ge.f32.partialorder %v1289_v56, 0.0 }
 0x901   : > { %v1291_v13 = vsel %vm1290_vm8, 1.0, %v1854_v12 }
 0x902   : > { %v1293_v59 = vmul.f32 0.3275911, %v1292_v58  ;;  %v1305_v61 = vsub.f32 0.0, %v1292_v58 }
 0x904   : > { %v1294_v60 = vadd.f32 1.0, %v1293_v59  ;;  %v1306_v17 = vmul.f32 %v1305_v61, %v1292_v58 }
 0x906   : > { %1819 = vrcp.f32 %v1294_v60  ;;  %v1307_v1 = vmul.f32 1.442695, %v1306_v17 }
 0x908   : > { %1821 = vpow2.f32 %v1307_v1 }
 0x910   : > { %v1820_v62 = vpop.eup %1819 }
 0x911   : > { %v1296_v63 = vmul.f32 1.0614054, %v1820_v62 }
 0x912   : > { %v1822_v9 = vpop.eup %1821 }
 0x913   : > { %v1297_v0 = vadd.f32 -1.4531521, %v1296_v63 }
 0x915   : > { %v1298_v2 = vmul.f32 %v1820_v62, %v1297_v0 }
 0x917   : > { %v1299_v3 = vadd.f32 1.4214138, %v1298_v2 }
 0x919   : > { %v1300_v4 = vmul.f32 %v1820_v62, %v1299_v3 }
 0x91b   : > { %v1301_v5 = vadd.f32 -0.28449672, %v1300_v4 }
 0x91d   : > { %v1302_v6 = vmul.f32 %v1820_v62, %v1301_v5 }
 0x91f   : > { %v1303_v7 = vadd.f32 0.2548296, %v1302_v6 }
 0x921   : > { %v1304_v8 = vmul.f32 %v1820_v62, %v1303_v7 }
 0x923   : > { %v1309_v10 = vmul.f32 %v1822_v9, %v1304_v8 }
 0x925   : > { %v1310_v11 = vsub.f32 1.0, %v1309_v10 }
 0x927   : > { %v1311_v14 = vmul.f32 %v1310_v11, %v1291_v13 }
 0x929   : > { %v1312_v16 = vadd.f32 1.0, %v1311_v14 }
 0x92b   : > { %v1313_v18 = vmul.f32 %v1312_v16, %v1288_v15 }
 0x92d   : > { %v1314_v20 = vpack.c.bf16 %v1313_v18, %v1313_v18 }
 0x92f   : > { %1764 = vmatmul.mubr.msk.bf16.vlgmr.msra.gmra.mrb[12].mxu0 %vm1354_vm9, %v1314_v20 }
 0xa02   : > { %v1392_v22 = vpop.f32.mrb[12].mxu0 }
 0xa03   : > { %v1393_v23 = vadd.f32 %v1665_v21, %v1392_v22  ;;  %v1765_v24 = vpop.f32.mrb[13].mxu0 }
 0xa04   : > { %v1395_v25 = vpop.f32.mrb[14].mxu0 }
 0xa05   : > { %v1766_v26 = vpop.f32.mrb[15].mxu0  ;;  %v1398_v27 = vadd.f32 %v1393_v23, %v1220_v45 }
 0xa07   : > { %v1401_v28 = vsel %vm1192_vm7, %v1398_v27, 0.0 }
 0xa08   : > { %1402 = vadd.xlane.f32.xlu0 %v1401_v28 }
 0xa95   : > { %v1403_v29 = vpop.xlane.xlu0 %1402 }
 0xa96   : > { %v1404_v30 = vmul.f32 0.03125, %v1403_v29 }
 0xa98   : > { %v1405_v31 = vsub.f32 %v1398_v27, %v1404_v30 }
 0xa9a   : > { %v1406_v32 = vmul.f32 %v1405_v31, %v1405_v31 }
 0xa9c   : > { %v1407_v33 = vsel %vm1192_vm7, %v1406_v32, 0.0 }
 0xa9d   : > { %1408 = vadd.xlane.f32.xlu1 %v1407_v33 }
 0xb2a   : > { %v1409_v34 = vpop.xlane.xlu1 %1408 }
 0xb2b   : > { %v1410_v35 = vmul.f32 0.03125, %v1409_v34 }
 0xb2d   : > { %v1411_v36 = vadd.f32 1e-12, %v1410_v35 }
 0xb2f   : > { %1823 = vrsqrt.f32 %v1411_v36 }
 0xb39   : > { %v1824_v37 = vpop.eup %1823 }
 0xb3a   : > { %v1413_v38 = vmul.f32 %v1824_v37, %v1405_v31 }
 0xb3c   : > { %v1420_v40 = vmul.f32 %v1671_v19, %v1413_v38 }
 0xb3e   : > { %v1427_v41 = vadd.f32 %v1672_v39, %v1420_v40 }
 0xb40   : > { %1428 = vst.msk [vmem:[#allocation2] sm:$0x3] %vm1192_vm7, %v1427_v41  ;;  %1429 = vst.msk [vmem:[%s2191_s22] sm:$0x3] %vm1192_vm7, %v1427_v41 }
 0xb41 PF: > { %s2192_s17 = sld [smem:[#allocation4_spill]]  ;;  %s2193_s21 = sld [smem:[#allocation3_spill]] }
 0xb42   : > { %s2194_s22 = sld [smem:[#allocation5_spill]] }
 0xb47   : > { %s26_s23 = sadd.s32 1, %s2192_s17  }
 0xb48   : > { %p23_p6 = scmp.ge.s32.totalorder %s26_s23, 4  }
 0xb4a   :  { %25 = sbr.rel (!%p23_p6) target bundleno = 7 (0x7), region = 159 }

// kernel: cobert_forward.2
= control target key start
LH: loop header
LB: loop body
LE: loop exit
PB: predicated region body
PF: predicated region fallthrough
CT: control target
= control target key end

     0   :  { %s1971_s21 = smov 0   ;;  %s1973_s22 = smov 0   ;;  %s2226_s0 = inlined_call_operand.vmem [shape: f32[2,8,32], index: 0, kind: input, shape index: {}]   ;;  %s2227_s1 = inlined_call_operand.vmem [shape: f32[2,1,8], index: 1, kind: input, shape index: {}]   ;;  %s2228_s2 = inlined_call_operand.vmem [shape: f32[1,32], index: 2, kind: input, shape index: {}]   ;;  %s2229_s3 = inlined_call_operand.vmem [shape: f32[1,32], index: 3, kind: input, shape index: {}]   ;;  %s2230_s4 = inlined_call_operand.vmem [shape: bf16[2,32,96], index: 4, kind: input, shape index: {}]   ;;  %s2231_s5 = inlined_call_operand.vmem [shape: f32[2,1,96], index: 5, kind: input, shape index: {}]   ;;  %s2232_s6 = inlined_call_operand.vmem [shape: bf16[2,32,32], index: 6, kind: input, shape index: {}]   ;;  %s2233_s7 = inlined_call_operand.vmem [shape: f32[2,1,32], index: 7, kind: input, shape index: {}, may-alias: {7,9,13,15}]   ;;  %s2234_s8 = inlined_call_operand.vmem [shape: f32[2,1,32], index: 8, kind: input, shape index: {}, may-alias: {8,14}]   ;;  %s2235_s9 = inlined_call_operand.vmem [shape: f32[2,1,32], index: 9, kind: input, shape index: {}, may-alias: {7,9,13,15}]   ;;  %s2236_s10 = inlined_call_operand.vmem [shape: bf16[2,32,64], index: 10, kind: input, shape index: {}]   ;;  %s2237_s11 = inlined_call_operand.vmem [shape: f32[2,1,64], index: 11, kind: input, shape index: {}]   ;;  %s2238_s12 = inlined_call_operand.vmem [shape: bf16[2,64,32], index: 12, kind: input, shape index: {}]   ;;  %s2239_s13 = inlined_call_operand.vmem [shape: f32[2,1,32], index: 13, kind: input, shape index: {}, may-alias: {7,9,13,15}]   ;;  %s2240_s14 = inlined_call_operand.vmem [shape: f32[2,1,32], index: 14, kind: input, shape index: {}, may-alias: {8,14}]   ;;  %s2241_s15 = inlined_call_operand.vmem [shape: f32[2,1,32], index: 15, kind: input, shape index: {}, may-alias: {7,9,13,15}]   ;;  %s2242_s16 = inlined_call_operand.vmem [shape: f32[2,8,32], index: 16, kind: output, shape index: {}]  }
   0x1   :  { %2249 = sst [smem:[#allocation11_spill]] %s2226_s0  ;;  %s1975_s23 = smov 0  }
   0x2   :  { %2250 = sst [smem:[#allocation12_spill]] %s2227_s1  ;;  %s1977_s24 = smov 0  }
   0x3   :  { %2251 = sst [smem:[#allocation13_spill]] %s2228_s2  ;;  %s1979_s25 = smov 0  }
   0x4   :  { %2252 = sst [smem:[#allocation14_spill]] %s2229_s3 }
   0x5   :  { %2253 = sst [smem:[#allocation15_spill]] %s2230_s4 }
   0x6   :  { %2254 = sst [smem:[#allocation16_spill]] %s2232_s6 }
   0x7   :  { %2255 = sst [smem:[#allocation17_spill]] %s2236_s10 }
   0x8   :  { %2256 = sst [smem:[#allocation18_spill]] %s2237_s11 }
   0x9   :  { %2257 = sst [smem:[#allocation19_spill]] %s2241_s15 }
   0xa   :  { %2258 = sst [smem:[#allocation20_spill]] %s2242_s16 }
   0xb LB: > { %2259 = sst [smem:[#allocation3_spill]] %s1862_s21  ;;  %s35_s26 = sadd.s32 1, %s1870_s23  ;;  %s1878_s25 = sphi %s1979_s25, %s26_s25   ;;  %s1874_s24 = sphi %s1977_s24, %s2294_s24   ;;  %s1870_s23 = sphi %s1975_s23, %s2293_s23   ;;  %s1866_s22 = sphi %s1973_s22, %s2292_s22   ;;  %s1862_s21 = sphi %s1971_s21, %s2291_s21  }
   0xc   : > { %2260 = sst [smem:[#allocation4_spill]] %s1866_s22  ;;  %s38_s27 = sadd.s32 1, %s1874_s24 }
   0xd   : > { %2261 = sst [smem:[#allocation5_spill]] %s1870_s23  ;;  %p36_p0 = scmp.ge.s32.totalorder %s35_s26, 2 }
   0xe   : > { %2262 = sst [smem:[#allocation6_spill]] %s1874_s24  ;;  %p1629_p1 = scmp.ge.s32.totalorder %s1878_s25, 1 }
   0xf   : > { %2263 = sst [smem:[#allocation7_spill]] %s1878_s25  ;;  %p585_p2 = scmp.lt.s32.totalorder %s1878_s25, 5 }
  0x10   : > { %s2296_s26 = smov (%p36_p0, %s35_s26), 0  ;;  %s2298_s27 = smov (!%p36_p0, %s38_s27), %s1874_s24 }
  0x11   : > { %2264 = sst [smem:[#allocation8_spill]] %s2296_s26  ;;  %p586_p3 = pnand %p1629_p1, %p585_p2 }
  0x12   : > { %p40_p4 = scmp.ge.s32.totalorder %s2298_s27, 2 }
  0x13   : > { %589 = sbr.rel (%p586_p3) target bundleno = 2892 (0xb4c), region = 84 }
  0x14   : > { %s2300_s27 = smov (%p40_p4, %s2298_s27), 0 }
  0x15   : > { %2265 = sst [smem:[#allocation9_spill]] %s2300_s27 }
  0x1a   : > { %p680_p5 = scmp.lt.s32.totalorder %s1862_s21, 1  ;;  %p687_p6 = scmp.lt.s32.totalorder %s1866_s22, 1 }
  0x1b   : > { %s2268_s27 = sld [smem:[#allocation11_spill]]  ;;  %s2269_s4 = sld [smem:[#allocation15_spill]] }
  0x1c   : > { %s2008_s28 = scalar_select %p680_p5, %s1862_s21, 1 }
  0x1d   : > { %s2011_s29 = scalar_select %p687_p6, %s1866_s22, 1 }
  0x1e   : > { %2266 = sst [smem:[#allocation10_spill]] %s2008_s28  ;;  %s1630_s30 = sshll.u32 %s2008_s28, 3 }
  0x1f   : > { %s1675_s24 = sshll.u32 %s2011_s29, 4  ;;  %s2270_s6 = sld [smem:[#allocation16_spill]] }
  0x20   : > { %s2271_s10 = sld [smem:[#allocation17_spill]]  ;;  %s724_s19 = scalar_lea.vmem %s2239_s13, %s2011_s29 }
  0x21   : > { %s683_s26 = scalar_lea.vmem %s2268_s27, %s1630_s30  ;;  %s2025_s3 = scalar_lea.vmem %s2269_s4, %s1675_s24 }
  0x22   : > { %s727_s28 = scalar_lea.vmem %s2240_s14, %s2011_s29  ;;  %s2273_s4 = sld [smem:[#allocation19_spill]] }
  0x23   : > { %s2274_s22 = sld [smem:[#allocation20_spill]]  ;;  %s2275_s18 = sld [smem:[#allocation4_spill]] }
  0x25   : > { %s2034_s0 = scalar_lea.vmem %s2270_s6, %s1675_s24  ;;  %s1678_s6 = sshll.u32 %s2011_s29, 5 }
  0x26   : > { %s2051_s21 = scalar_lea.vmem %s2271_s10, %s1675_s24  ;;  %s2065_s1 = scalar_lea.vmem %s2238_s12, %s1678_s6 }
  0x28   : > { %s730_s10 = scalar_lea.vmem %s2273_s4, %s2011_s29 }
  0x29   : > { %s2078_s11 = scalar_lea.vmem %s2274_s22, %s1630_s30  ;;  %p1640_p7 = scmp.ne.s32.totalorder %s2275_s18, 0 }
  0x2a   : > { %v740_v0 = vld [vmem:[%s683_s26] sm:$0xff] (!%p1640_p7)  ;;  %s2276_s17 = sld [smem:[#allocation3_spill]] (!%p1640_p7)  ;;  %vm743_vm0 = vcmask (!%p1640_p7), 261120   ;;  %s2278_s20 = sld [smem:[#allocation14_spill]] (!%p1640_p7) }
  0x2b   : > { %739 = sbr.rel (%p1640_p7) target bundleno = 357 (0x165), region = 88  ;;  %v744_v1 = vsel (!%p1640_p7), %vm743_vm0, %v740_v0, 0.0  ;;  %s2277_s22 = sld [smem:[#allocation13_spill]] (!%p1640_p7) }
  0x2c   : > { %745 = vadd.xlane.f32.xlu0 (!%p1640_p7), %v744_v1 }
  0x30   : > { %s1643_s26 = sshll.u32 (!%p1640_p7), %s2276_s17, 3  ;;  %v1642_v13 = vld [vmem:[%s2278_s20] ss:$0 sm:$0xff] (!%p1640_p7) }
  0x31   : > { %v1641_v11 = vld [vmem:[%s2277_s22] ss:$0 sm:$0xff] (!%p1640_p7)  ;;  %s773_s23 = scalar_lea.vmem (!%p1640_p7), [#allocation2], %s1643_s26 }
  0xb9   : > { %v746_v2 = vpop.xlane.xlu0 %745 }
  0xba   : > { %v748_v3 = vmul.f32 0.03125, %v746_v2 }
  0xbc   : > { %v749_v4 = vsub.f32 %v740_v0, %v748_v3 }
  0xbe   : > { %v750_v5 = vmul.f32 %v749_v4, %v749_v4 }
  0xc0   : > { %v751_v6 = vsel %vm743_vm0, %v750_v5, 0.0 }
  0xc1   : > { %752 = vadd.xlane.f32.xlu0 %v751_v6 }
 0x14e   : > { %v753_v7 = vpop.xlane.xlu0 %752 }
 0x14f   : > { %v754_v8 = vmul.f32 0.03125, %v753_v7 }
 0x151   : > { %v755_v9 = vadd.f32 1e-12, %v754_v8 }
 0x153   : > { %1812 = vrsqrt.f32 %v755_v9 }
 0x15d   : > { %v1813_v10 = vpop.eup %1812 }
 0x15e   : > { %v757_v12 = vmul.f32 %v1813_v10, %v749_v4 }
 0x160   : > { %v764_v14 = vmul.f32 %v1641_v11, %v757_v12 }
 0x162   : > { %v771_v15 = vadd.f32 %v1642_v13, %v764_v14 }
 0x164   : > { %774 = vst.msk [vmem:[%s773_s23] sm:$0xff] %vm743_vm0, %v771_v15 }
 0x165 PF: > { %s2279_s25 = sld [smem:[#allocation3_spill]]  ;;  %v1814_v16 = vld [vmem:[%s2025_s3] sm:$0xff]   ;;  %v1880_v17 = vmov 0.0   ;;  %v1815_v18 = vld [vmem:[%s2025_s3 + $0x8] sm:$0xff]   ;;  %vm1881_vm1 = vmmov 0   ;;  %vm802_vm2 = vcmask 261120   ;;  %s2280_s16 = scalar_lea.vmem %s2231_s5, %s2011_s29 }
 0x166   : > { %1702 = vmatprep.subr.bf16.mxu1 %v1880_v17  ;;  %1716 = vmatprep.subr.bf16.mxu0 %v1880_v17  ;;  %v1645_v21 = vld [vmem:[%s2280_s16] ss:$0 sm:$0xff]  ;;  %s1882_s18 = smov 112   ;;  %s1883_s17 = smov 96   ;;  %vm859_vm3 = vcmask 130048   ;;  %vm954_vm4 = vcmask 64512  }
 0x167   : > { %1703 = vmatpush3.bf16.msra.mxu1 %v1814_v16  ;;  %1706 = vmatprep.mubr.msk.bf16.mxu1 %vm1881_vm1, %v1880_v17  ;;  %s2281_s4 = sld [smem:[#allocation10_spill]]  ;;  %s2282_s26 = sld [smem:[#allocation12_spill]]  ;;  %vm984_vm5 = vcmask 1043456   ;;  %v1817_v62 = vld [vmem:[%s2034_s0 + $0x8] sm:$0xff]   ;;  %v1816_v4 = vld [vmem:[%s2034_s0] sm:$0xff]   ;;  %vm1352_vm7 = vcmask 523264  }
 0x168   : > { %1704 = vmatprep.subr.bf16.mxu1 %v1880_v17  ;;  %1718 = vmatprep.mubr.msk.bf16.mxu0 %vm1881_vm1, %v1880_v17  ;;  %s1884_s27 = smov 64   ;;  %s2284_s23 = scalar_lea.vmem %s2233_s7, %s2011_s29 }
 0x169   : > { %s2285_s3 = scalar_lea.vmem %s2234_s8, %s2011_s29 }
 0x16b   : > { %s1644_s24 = sshll.u32 %s2279_s25, 3  ;;  %1705 = vmatpush3.bf16.msra.mxu1 %v1815_v18 }
 0x16c   : > { %s2101_s2 = scalar_lea.vmem [#allocation2], %s1644_s24  ;;  %1710 = vmatprep.subr.bf16.mxu1 %v1880_v17 }
 0x16d   : > { %v2104_v19 = vld [vmem:[%s2101_s2] sm:$0xff]  ;;  %s2283_s30 = scalar_lea.vmem %s2282_s26, %s2281_s4  ;;  %s2287_s4 = sld [smem:[#allocation18_spill]] }
 0x16e   : > { %v778_v20 = vpack.c.bf16 %v2104_v19, %v2104_v19  ;;  %v1649_v33 = vld [vmem:[%s2283_s30] ss:$0 sm:$0xff] }
 0x170   : > { %1707 = vmatmul.mubr.msk.bf16.vlgmr.msra.gmra.mrb[0].mxu1 %vm802_vm2, %v778_v20 }
 0x171   : > { %1712 = vmatprep.mubr.msk.bf16.mxu1 %vm1881_vm1, %v1880_v17 }
 0x173   : > { %s2288_s6 = scalar_lea.vmem %s2287_s4, %s2011_s29 }
 0x243   : > { %v840_v22 = vpop.f32.mrb[0].mxu1 }
 0x244   : > { %v841_v23 = vadd.f32 %v1645_v21, %v840_v22  ;;  %v1708_v24 = vpop.f32.mrb[1].mxu1 }
 0x245   : > { %v843_v25 = vpop.f32.mrb[2].mxu1 }
 0x246   : > { %v846_v26 = vpack.c.bf16 %v841_v23, %v841_v23  ;;  %v1709_v27 = vpop.f32.mrb[3].mxu1  ;;  %v1658_v23 = vld [vmem:[%s2284_s23] ss:$0 sm:$0xff] }
 0x248   : > { %848 = vrot.lane.b32.xlu0 %v846_v26, %s1882_s18  ;;  %s2286_s18 = scalar_lea.vmem %s2235_s9, %s2011_s29 }
 0x24c   : > { %857 = vrot.lane.b32.xlu0 %v846_v26, %s1883_s17 }
 0x2ba   : > { %v849_v28 = vpop.permute.xlu0 %848 }
 0x2bb   : > { %906 = vrot.lane.b32.xlu1 %v849_v28, %s1883_s17 }
 0x2be   : > { %v858_v29 = vpop.permute.xlu0 %857 }
 0x2bf   : > { %v864_v30 = vsel %vm859_vm3, %v858_v29, 0 }
 0x2c0   : > { %1711 = vmatpush3.bf16.xpose.msra.mxu1 %v864_v30 }
 0x2c1   : > { %1722 = vmatprep.subr.bf16.mxu1 %v1880_v17 }
 0x2c7   : > { %1713 = vmatmul.mubr.msk.bf16.vlgmr.msra.gmra.mrb[4].mxu1 %vm859_vm3, %v846_v26 }
 0x2c8   : > { %1724 = vmatprep.mubr.msk.bf16.mxu1 %vm1881_vm1, %v1880_v17 }
 0x32d   : > { %v907_v31 = vpop.permute.xlu1 %906 }
 0x32e   : > { %v912_v32 = vsel %vm859_vm3, %v907_v31, 0 }
 0x32f   : > { %1717 = vmatpush3.bf16.xpose.msra.mxu0 %v912_v32 }
 0x330   : > { %1728 = vmatprep.subr.bf16.mxu0 %v1880_v17 }
 0x336   : > { %1719 = vmatmul.mubr.msk.bf16.vlgmr.msra.gmra.mrb[0].mxu0 %vm859_vm3, %v849_v28 }
 0x337   : > { %1730 = vmatprep.mubr.msk.bf16.mxu0 %vm1881_vm1, %v1880_v17 }
 0x39a   : > { %v900_v34 = vpop.f32.mrb[4].mxu1 }
 0x39b   : > { %v901_v35 = vadd.f32 %v1649_v33, %v900_v34  ;;  %v1714_v36 = vpop.f32.mrb[5].mxu1 }
 0x39c   : > { %v903_v37 = vpop.f32.mrb[6].mxu1  ;;  %v1818_v36 = vld [vmem:[%s2051_s21] sm:$0xff]  }
 0x39d   : > { %v1715_v38 = vpop.f32.mrb[7].mxu1  ;;  %v955_v39 = vsel %vm954_vm4, %v901_v35, -inf  ;;  %v1819_v37 = vld [vmem:[%s2051_s21 + $0x8] sm:$0xff]  }
 0x39e   : > { %956 = vmax.xlane.f32.xlu1 %v955_v39 }
 0x409   : > { %v948_v40 = vpop.f32.mrb[0].mxu0 }
 0x40a   : > { %v949_v41 = vadd.f32 %v1649_v33, %v948_v40  ;;  %v1720_v42 = vpop.f32.mrb[1].mxu0 }
 0x40b   : > { %v951_v43 = vpop.f32.mrb[2].mxu0 }
 0x40c   : > { %v1721_v44 = vpop.f32.mrb[3].mxu0  ;;  %v958_v45 = vsel %vm954_vm4, %v949_v41, -inf  ;;  %v1660_v43 = vld [vmem:[%s2286_s18] ss:$0 sm:$0xff] }
 0x40d   : > { %959 = vmax.xlane.f32.xlu0 %v958_v45 }
 0x42b   : > { %v957_v46 = vpop.xlane.xlu1 %956 }
 0x42c   : > { %v961_v47 = vsub.f32 %v901_v35, %v957_v46 }
 0x42e   : > { %v963_v48 = vmul.f32 1.442695, %v961_v47  ;;  %v1820_v47 = vld [vmem:[%s2065_s1] sm:$0xff]  }
 0x430   : > { %1824 = vpow2.f32 %v963_v48  ;;  %v1821_v48 = vld [vmem:[%s2065_s1 + $0x8] sm:$0xff]  }
 0x43a   : > { %v1825_v49 = vpop.eup %1824 }
 0x43b   : > { %v967_v50 = vsel %vm954_vm4, %v1825_v49, 0.0 }
 0x43c   : > { %968 = vadd.xlane.f32.xlu0 %v967_v50  ;;  %v1823_v50 = vld [vmem:[%s2065_s1 + $0x18] sm:$0xff]  }
 0x452   : > { %979 = vrot.lane.b32.xlu0 %v846_v26, %s1884_s27 }
 0x49a   : > { %v960_v51 = vpop.xlane.xlu0 %959 }
 0x49b   : > { %v962_v52 = vsub.f32 %v949_v41, %v960_v51  ;;  %v1659_v41 = vld [vmem:[%s2285_s3] ss:$0 sm:$0xff] }
 0x49c   : > { %v1661_v51 = vld [vmem:[%s2288_s6] ss:$0 sm:$0xff] }
 0x49d   : > { %v965_v53 = vmul.f32 1.442695, %v962_v52 }
 0x49f   : > { %1826 = vpow2.f32 %v965_v53 }
 0x4a9   : > { %v1827_v54 = vpop.eup %1826 }
 0x4aa   : > { %v970_v55 = vsel %vm954_vm4, %v1827_v54, 0.0 }
 0x4ab   : > { %971 = vadd.xlane.f32.xlu1 %v970_v55 }
 0x4bc   : > { %1028 = vrot.lane.b32.xlu1 %v849_v28, %s1884_s27 }
 0x4c9   : > { %v969_v56 = vpop.xlane.xlu0 %968 }
 0x4ca   : > { %1828 = vrcp.f32 %v969_v56 }
 0x4cd   : > { %v980_v57 = vpop.permute.xlu0 %979 }
 0x4ce   : > { %v986_v58 = vsel %vm984_vm5, %v980_v57, 0 }
 0x4cf   : > { %1723 = vmatpush3.bf16.msra.mxu1 %v986_v58 }
 0x4d0   : > { %1734 = vmatprep.subr.bf16.mxu1 %v1880_v17 }
 0x4d4   : > { %v1829_v59 = vpop.eup %1828 }
 0x4d5   : > { %v975_v60 = vmul.f32 %v1829_v59, %v1825_v49  ;;  %v1822_v49 = vld [vmem:[%s2065_s1 + $0x10] sm:$0xff]  }
 0x4d7   : > { %v977_v61 = vpack.c.bf16 %v975_v60, %v975_v60 }
 0x4d9   : > { %1725 = vmatmul.mubr.msk.bf16.vlgmr.msra.gmra.mrb[8].mxu1 %vm954_vm4, %v977_v61 }
 0x4da   : > { %1736 = vmatprep.mubr.msk.bf16.mxu1 %vm1881_vm1, %v1880_v17  ;;  %1735 = vmatpush3.bf16.msra.mxu1 %v1817_v62 }
 0x4db   : > { %1746 = vmatprep.subr.bf16.mxu1 %v1880_v17 }
 0x538   : > { %v972_v63 = vpop.xlane.xlu1 %971 }
 0x539   : > { %1830 = vrcp.f32 %v972_v63 }
 0x53c   : > { %v1029_v0 = vpop.permute.xlu1 %1028 }
 0x53d   : > { %v1034_v1 = vsel %vm984_vm5, %v1029_v0, 0 }
 0x53e   : > { %1729 = vmatpush3.bf16.msra.mxu0 %v1034_v1 }
 0x53f   : > { %1740 = vmatprep.subr.bf16.mxu0 %v1880_v17 }
 0x543   : > { %v1831_v2 = vpop.eup %1830 }
 0x544   : > { %v976_v3 = vmul.f32 %v1831_v2, %v1827_v54 }
 0x546   : > { %v978_v5 = vpack.c.bf16 %v976_v3, %v976_v3 }
 0x548   : > { %1731 = vmatmul.mubr.msk.bf16.vlgmr.msra.gmra.mrb[4].mxu0 %vm954_vm4, %v978_v5 }
 0x549   : > { %1741 = vmatpush3.bf16.msra.mxu0 %v1816_v4  ;;  %1742 = vmatprep.mubr.msk.bf16.mxu0 %vm1881_vm1, %v1880_v17 }
 0x54a   : > { %1754 = vmatprep.subr.bf16.mxu0 %v1880_v17 }
 0x5ac   : > { %v1022_v6 = vpop.f32.mrb[8].mxu1 }
 0x5ad   : > { %v1076_v7 = vpack.c.bf16 %v1022_v6, %v1022_v6  ;;  %v1726_v8 = vpop.f32.mrb[9].mxu1 }
 0x5ae   : > { %v1025_v9 = vpop.f32.mrb[10].mxu1 }
 0x5af   : > { %v1727_v10 = vpop.f32.mrb[11].mxu1  ;;  %1743 = vmatmul.mubr.msk.bf16.vlgmr.msra.gmra.mrb[8].mxu0 %vm859_vm3, %v1076_v7 }
 0x5b0   : > { %1762 = vmatprep.mubr.msk.bf16.mxu0 %vm1881_vm1, %v1880_v17  ;;  %1755 = vmatpush3.bf16.msra.mxu0 %v1820_v47 }
 0x5b1   : > { %1756 = vmatprep.subr.bf16.mxu0 %v1880_v17 }
 0x5b4   : > { %1757 = vmatpush3.bf16.msra.mxu0 %v1821_v48 }
 0x5b5   : > { %1758 = vmatprep.subr.bf16.mxu0 %v1880_v17 }
 0x5b8   : > { %1759 = vmatpush3.bf16.msra.mxu0 %v1822_v49 }
 0x5b9   : > { %1760 = vmatprep.subr.bf16.mxu0 %v1880_v17 }
 0x5bc   : > { %1761 = vmatpush3.bf16.msra.mxu0 %v1823_v50 }
 0x61b   : > { %v1070_v11 = vpop.f32.mrb[4].mxu0 }
 0x61c   : > { %v1077_v12 = vpack.c.bf16 %v1070_v11, %v1070_v11  ;;  %v1732_v13 = vpop.f32.mrb[5].mxu0 }
 0x61d   : > { %v1073_v14 = vpop.f32.mrb[6].mxu0 }
 0x61e   : > { %v1733_v15 = vpop.f32.mrb[7].mxu0  ;;  %1737 = vmatmul.mubr.msk.bf16.vlgmr.msra.gmra.mrb[12].mxu1 %vm859_vm3, %v1077_v12  ;;  %v1885_v12 = vmov -1.0  }
 0x61f   : > { %1750 = vmatprep.mubr.msk.bf16.mxu1 %vm1881_vm1, %v1880_v17  ;;  %1747 = vmatpush3.bf16.msra.mxu1 %v1818_v36 }
 0x620   : > { %1748 = vmatprep.subr.bf16.mxu1 %v1880_v17 }
 0x623   : > { %1749 = vmatpush3.bf16.msra.mxu1 %v1819_v37 }
 0x682   : > { %v1174_v16 = vpop.f32.mrb[8].mxu0 }
 0x683   : > { %v1744_v18 = vpop.f32.mrb[9].mxu0 }
 0x684   : > { %v1177_v20 = vpop.f32.mrb[10].mxu0 }
 0x685   : > { %v1745_v21 = vpop.f32.mrb[11].mxu0 }
 0x686   : > { %v1665_v21 = vld [vmem:[%s724_s19] ss:$0 sm:$0xff] }
 0x6f1   : > { %v1125_v22 = vpop.f32.mrb[12].mxu1 }
 0x6f2   : > { %v1175_v24 = vadd.f32 %v1174_v16, %v1125_v22  ;;  %v1738_v25 = vpop.f32.mrb[13].mxu1 }
 0x6f3   : > { %v1128_v26 = vpop.f32.mrb[14].mxu1 }
 0x6f4   : > { %v1187_v27 = vadd.f32 %v1658_v23, %v1175_v24  ;;  %v1739_v28 = vpop.f32.mrb[15].mxu1 }
 0x6f6   : > { %v1188_v29 = vadd.f32 %v1187_v27, %v2104_v19 }
 0x6f8   : > { %v1191_v30 = vsel %vm802_vm2, %v1188_v29, 0.0 }
 0x6f9   : > { %1192 = vadd.xlane.f32.xlu1 %v1191_v30 }
 0x786   : > { %v1193_v31 = vpop.xlane.xlu1 %1192 }
 0x787   : > { %v1195_v32 = vmul.f32 0.03125, %v1193_v31 }
 0x789   : > { %v1196_v33 = vsub.f32 %v1188_v29, %v1195_v32 }
 0x78b   : > { %v1197_v34 = vmul.f32 %v1196_v33, %v1196_v33 }
 0x78d   : > { %v1198_v35 = vsel %vm802_vm2, %v1197_v34, 0.0 }
 0x78e   : > { %1199 = vadd.xlane.f32.xlu0 %v1198_v35 }
 0x81b   : > { %v1200_v19 = vpop.xlane.xlu0 %1199 }
 0x81c   : > { %v1201_v38 = vmul.f32 0.03125, %v1200_v19  ;;  %v1671_v19 = vld [vmem:[%s727_s28] ss:$0 sm:$0xff] }
 0x81e   : > { %v1202_v39 = vadd.f32 1e-12, %v1201_v38 }
 0x820   : > { %1832 = vrsqrt.f32 %v1202_v39  ;;  %v1672_v39 = vld [vmem:[%s730_s10] ss:$0 sm:$0xff] }
 0x82a   : > { %v1833_v40 = vpop.eup %1832 }
 0x82b   : > { %v1204_v42 = vmul.f32 %v1833_v40, %v1196_v33 }
 0x82d   : > { %v1211_v44 = vmul.f32 %v1659_v41, %v1204_v42 }
 0x82f   : > { %v1218_v45 = vadd.f32 %v1660_v43, %v1211_v44 }
 0x831   : > { %v1219_v46 = vpack.c.bf16 %v1218_v45, %v1218_v45 }
 0x833   : > { %1751 = vmatmul.mubr.msk.bf16.vlgmr.msra.gmra.mrb[16].mxu1 %vm802_vm2, %v1219_v46 }
 0x906   : > { %v1280_v52 = vpop.f32.mrb[16].mxu1 }
 0x907   : > { %v1281_v53 = vadd.f32 %v1661_v51, %v1280_v52  ;;  %v1752_v54 = vpop.f32.mrb[17].mxu1 }
 0x908   : > { %v1283_v55 = vpop.f32.mrb[18].mxu1 }
 0x909   : > { %v1287_v56 = vmul.f32 0.70710677, %v1281_v53  ;;  %v1753_v57 = vpop.f32.mrb[19].mxu1  ;;  %v1286_v15 = vmul.f32 0.5, %v1281_v53 }
 0x90b   : > { %v1290_v58 = vand.u32 2147483647, %v1287_v56  ;;  %vm1288_vm6 = vcmp.ge.f32.partialorder %v1287_v56, 0.0 }
 0x90c   : > { %v1289_v13 = vsel %vm1288_vm6, 1.0, %v1885_v12 }
 0x90d   : > { %v1291_v59 = vmul.f32 0.3275911, %v1290_v58  ;;  %v1303_v61 = vsub.f32 0.0, %v1290_v58 }
 0x90f   : > { %v1292_v60 = vadd.f32 1.0, %v1291_v59  ;;  %v1304_v17 = vmul.f32 %v1303_v61, %v1290_v58 }
 0x911   : > { %1834 = vrcp.f32 %v1292_v60  ;;  %v1305_v1 = vmul.f32 1.442695, %v1304_v17 }
 0x913   : > { %1836 = vpow2.f32 %v1305_v1 }
 0x91b   : > { %v1835_v62 = vpop.eup %1834 }
 0x91c   : > { %v1294_v63 = vmul.f32 1.0614054, %v1835_v62 }
 0x91d   : > { %v1837_v9 = vpop.eup %1836 }
 0x91e   : > { %v1295_v0 = vadd.f32 -1.4531521, %v1294_v63 }
 0x920   : > { %v1296_v2 = vmul.f32 %v1835_v62, %v1295_v0 }
 0x922   : > { %v1297_v3 = vadd.f32 1.4214138, %v1296_v2 }
 0x924   : > { %v1298_v4 = vmul.f32 %v1835_v62, %v1297_v3 }
 0x926   : > { %v1299_v5 = vadd.f32 -0.28449672, %v1298_v4 }
 0x928   : > { %v1300_v6 = vmul.f32 %v1835_v62, %v1299_v5 }
 0x92a   : > { %v1301_v7 = vadd.f32 0.2548296, %v1300_v6 }
 0x92c   : > { %v1302_v8 = vmul.f32 %v1835_v62, %v1301_v7 }
 0x92e   : > { %v1307_v10 = vmul.f32 %v1837_v9, %v1302_v8 }
 0x930   : > { %v1308_v11 = vsub.f32 1.0, %v1307_v10 }
 0x932   : > { %v1309_v14 = vmul.f32 %v1308_v11, %v1289_v13 }
 0x934   : > { %v1310_v16 = vadd.f32 1.0, %v1309_v14 }
 0x936   : > { %v1311_v18 = vmul.f32 %v1310_v16, %v1286_v15 }
 0x938   : > { %v1312_v20 = vpack.c.bf16 %v1311_v18, %v1311_v18 }
 0x93a   : > { %1763 = vmatmul.mubr.msk.bf16.vlgmr.msra.gmra.mrb[12].mxu0 %vm1352_vm7, %v1312_v20 }
 0xa0d   : > { %v1390_v22 = vpop.f32.mrb[12].mxu0 }
 0xa0e   : > { %v1391_v23 = vadd.f32 %v1665_v21, %v1390_v22  ;;  %v1764_v24 = vpop.f32.mrb[13].mxu0 }
 0xa0f   : > { %v1393_v25 = vpop.f32.mrb[14].mxu0 }
 0xa10   : > { %v1765_v26 = vpop.f32.mrb[15].mxu0  ;;  %v1396_v27 = vadd.f32 %v1391_v23, %v1218_v45 }
 0xa12   : > { %v1399_v28 = vsel %vm802_vm2, %v1396_v27, 0.0 }
 0xa13   : > { %1400 = vadd.xlane.f32.xlu0 %v1399_v28 }
 0xaa0   : > { %v1401_v29 = vpop.xlane.xlu0 %1400 }
 0xaa1   : > { %v1402_v30 = vmul.f32 0.03125, %v1401_v29 }
 0xaa3   : > { %v1403_v31 = vsub.f32 %v1396_v27, %v1402_v30 }
 0xaa5   : > { %v1404_v32 = vmul.f32 %v1403_v31, %v1403_v31 }
 0xaa7   : > { %v1405_v33 = vsel %vm802_vm2, %v1404_v32, 0.0 }
 0xaa8   : > { %1406 = vadd.xlane.f32.xlu1 %v1405_v33 }
 0xb35   : > { %v1407_v34 = vpop.xlane.xlu1 %1406 }
 0xb36   : > { %v1408_v35 = vmul.f32 0.03125, %v1407_v34 }
 0xb38   : > { %v1409_v36 = vadd.f32 1e-12, %v1408_v35 }
 0xb3a   : > { %1838 = vrsqrt.f32 %v1409_v36 }
 0xb44   : > { %v1839_v37 = vpop.eup %1838 }
 0xb45   : > { %v1411_v38 = vmul.f32 %v1839_v37, %v1403_v31 }
 0xb47   : > { %v1418_v40 = vmul.f32 %v1671_v19, %v1411_v38 }
 0xb49   : > { %v1425_v41 = vadd.f32 %v1672_v39, %v1418_v40 }
 0xb4b   : > { %1426 = vst.msk [vmem:[%s2101_s2] sm:$0xff] %vm802_vm2, %v1425_v41  ;;  %1427 = vst.msk [vmem:[%s2078_s11] sm:$0xff] %vm802_vm2, %v1425_v41 }
 0xb4c PF: > { %s2290_s20 = sld [smem:[#allocation7_spill]]  ;;  %s2291_s21 = sld [smem:[#allocation5_spill]] }
 0xb4d   : > { %s2292_s22 = sld [smem:[#allocation6_spill]]  ;;  %s2293_s23 = sld [smem:[#allocation8_spill]] }
 0xb4e   : > { %s2294_s24 = sld [smem:[#allocation9_spill]] }
 0xb52   : > { %s26_s25 = sadd.s32 1, %s2290_s20  }
 0xb53   : > { %p23_p8 = scmp.ge.s32.totalorder %s26_s25, 6  }
 0xb55   :  { %25 = sbr.rel (!%p23_p8) target bundleno = 11 (0xb), region = 159 }

</bundles_post_ra>
